<compile_context>
chip_gen: v6e
topology: v6e:2x2x1
jax: 0.10.0
libtpu: 0.0.40
codegen_flags: <defaults>
</compile_context>

<pallas_src>
import functools
import math

import jax
import jax.numpy as jnp
from jax.experimental import pallas as pl
from jax.experimental.pallas import tpu as pltpu

LN_EPS = 1e-5            # nn.LayerNorm default
MAX_BATCH_BLOCK = 1024   # big blocks amortize per-grid-step overhead on v5e/v6e


def _round_up(n: int, m: int) -> int:
    return ((n + m - 1) // m) * m


# ----------------------------- fused Pallas kernel -------------------------- #

def _make_fused_kernel(feats, obs_pad, F):
    """feats: per-layer trunk widths (static ints); F = max(feats); lane width 2F."""
    L = 2 * F
    num_layers = len(feats)

    def kernel(x_ref, w_ref, vec_ref, out_ref):
        # Hoisted lane masks (computed once, reused by every layer).
        col = jax.lax.broadcasted_iota(jnp.int32, (1, L), 1)
        half = col < F                                   # actor half = lanes [0, F)
        real = {}                                        # real (non-padded) lanes per width
        for f in sorted(set(feats)):
            if f < F:
                real[f] = (col < f) | ((col >= F) & (col < F + f))

        h = x_ref[...]                                   # (bb, obs_pad) f32
        off = 0
        for l in range(num_layers):
            f = feats[l]
            k = obs_pad if l == 0 else L
            w = w_ref[off:off + k, :]                    # static slice of weight slab
            off += k
            b = vec_ref[3 * l:3 * l + 1, :]
            g = vec_ref[3 * l + 1:3 * l + 2, :]
            bt = vec_ref[3 * l + 2:3 * l + 3, :]

            # One MXU matmul for actor+critic (block-diag / concat packed weights).
            # TODO(synk): widths >=128 -> two dots per layer + bf16 operands.
            y = jnp.dot(h, w, preferred_element_type=jnp.float32) + b

            # Two LayerNorms via masked reductions on the combined (bb, 2F) tile.
            # Padded lanes of y are exactly 0 (zero weight cols / bias), so only the
            # variance sum needs the `real` mask; critic stats = total - actor part.
            inv_f = 1.0 / f
            tot = jnp.sum(y, axis=-1, keepdims=True)
            s_a = jnp.sum(jnp.where(half, y, 0.0), axis=-1, keepdims=True)
            mean = jnp.where(half, s_a, tot - s_a) * inv_f
            d = y - mean
            dsq = d * d
            if f < F:
                dsq = jnp.where(real[f], dsq, 0.0)
            tot_v = jnp.sum(dsq, axis=-1, keepdims=True)
            v_a = jnp.sum(jnp.where(half, dsq, 0.0), axis=-1, keepdims=True)
            var = jnp.where(half, v_a, tot_v - v_a) * inv_f
            yn = d * jax.lax.rsqrt(var + LN_EPS)
            # gamma/beta are zero on padded lanes -> padded lanes stay exactly 0.
            h = jnp.maximum(yn * g + bt, 0.0)

        # Fused heads: logits in lanes [0, A), value in lane A, rest zero.
        w_h = w_ref[off:off + L, :]
        b_h = vec_ref[3 * num_layers:3 * num_layers + 1, :]
        out = jnp.dot(h, w_h, preferred_element_type=jnp.float32) + b_h
        out_ref[...] = out.astype(out_ref.dtype)

    return kernel


# --------------------------- parameter setup -------------------------------- #

def init_linear_params(key, fan_in, fan_out):
    """Deterministic init mimicking PyTorch nn.Linear default (uniform +-1/sqrt(fan_in))."""
    kw, kb = jax.random.split(key)
    bound = 1.0 / math.sqrt(fan_in)
    w = jax.random.uniform(kw, (fan_in, fan_out), jnp.float32, -bound, bound)
    b = jax.random.uniform(kb, (1, fan_out), jnp.float32, -bound, bound)
    return w, b


def init_mlp_params(key, dims):
    """dims = [observation_dim] + features (matches the PyTorch Actor/Critic loop).

    Layer i: Linear(dims[i-1] if i > 0 else dims[0], dims[i]) + LayerNorm(dims[i]) + ReLU
    """
    layers = []
    for i, feat in enumerate(dims):
        fan_in = dims[i - 1] if i > 0 else dims[0]
        key, sub = jax.random.split(key)
        w, b = init_linear_params(sub, fan_in, feat)
        gamma = jnp.ones((1, feat), jnp.float32)     # nn.LayerNorm default
        beta = jnp.zeros((1, feat), jnp.float32)
        layers.append((w, b, gamma, beta))
    return layers, key


def init_rl_agent_params(key, observation_dim, action_dim, features):
    dims = [observation_dim] + list(features)
    actor_layers, key = init_mlp_params(key, dims)
    key, sub = jax.random.split(key)
    actor_head = init_linear_params(sub, dims[-1], action_dim)
    critic_layers, key = init_mlp_params(key, dims)
    key, sub = jax.random.split(key)
    critic_head = init_linear_params(sub, dims[-1], 1)
    return {
        "actor_layers": actor_layers,
        "actor_head": actor_head,
        "critic_layers": critic_layers,
        "critic_head": critic_head,
    }


def pack_rl_agent_params(params):
    """Pack everything into TWO slabs (weights + bias/gamma/beta rows), done once.

    Weight slab rows: [layer0 (obs_pad rows) | layer1..layerN-1 (2F rows) | head (2F rows)]
    Vector slab rows: [bias_l, gamma_l, beta_l per layer] + [head bias]
    Lane layout:      actor in [0, F), critic in [F, 2F); unused lanes zero.
    """
    actor_layers = params["actor_layers"]
    critic_layers = params["critic_layers"]
    feats = tuple(w.shape[1] for (w, _, _, _) in actor_layers)
    obs_dim = actor_layers[0][0].shape[0]
    obs_pad = _round_up(obs_dim, 8)
    F = max(feats)
    L = 2 * F

    def vec_row(f, a, c):
        r = jnp.zeros((1, L), jnp.float32)
        return r.at[:, :f].set(a).at[:, F:F + f].set(c)

    w_blocks, vec_rows = [], []
    for l, ((wa, ba, ga, bta), (wc, bc, gc, btc)) in enumerate(
            zip(actor_layers, critic_layers)):
        fan_in, f = wa.shape
        k = obs_pad if l == 0 else L
        w = jnp.zeros((k, L), jnp.float32)
        if l == 0:
            # Both trunks read the same x: plain fan_out concat (rows = obs).
            w = w.at[:fan_in, :f].set(wa).at[:fan_in, F:F + f].set(wc)
        else:
            # Input is [h_actor | h_critic]: block-diagonal weight.
            w = w.at[:fan_in, :f].set(wa).at[F:F + fan_in, F:F + f].set(wc)
        w_blocks.append(w)
        vec_rows += [vec_row(f, ba, bc), vec_row(f, ga, gc), vec_row(f, bta, btc)]

    wha, bha = params["actor_head"]      # (f_last, A), (1, A)
    whc, bhc = params["critic_head"]     # (f_last, 1), (1, 1)
    f_last = feats[-1]
    act_dim = wha.shape[1]
    assert act_dim + 1 <= L, "head wider than packed lane width"
    # TODO(synk): if profiling at very large batch shows the store epilogue binding,
    # pad the head output to 128 lanes so output stores are unmasked (lane-dense).
    w_h = jnp.zeros((L, L), jnp.float32)
    w_h = (w_h.at[:f_last, :act_dim].set(wha)
              .at[F:F + f_last, act_dim:act_dim + 1].set(whc))
    w_blocks.append(w_h)
    b_h = jnp.zeros((1, L), jnp.float32)
    b_h = b_h.at[:, :act_dim].set(bha).at[:, act_dim:act_dim + 1].set(bhc)
    vec_rows.append(b_h)

    return {"w": jnp.concatenate(w_blocks, axis=0),
            "vec": jnp.concatenate(vec_rows, axis=0),
            "feats": feats,
            "action_dim": act_dim}


# ------------------------------ forward ------------------------------------- #

def rl_agent_forward(w_slab, vec_slab, x, *, feats, action_dim, param_buffer_count=1):
    """Returns (policy_logits, value) exactly like RLAgent.forward."""
    batch, obs_dim = x.shape
    F = max(feats)
    L = 2 * F
    obs_pad = _round_up(obs_dim, 8)
    num_layers = len(feats)
    assert w_slab.shape == (obs_pad + num_layers * L, L), w_slab.shape
    assert vec_slab.shape == (3 * num_layers + 1, L), vec_slab.shape

    if obs_pad != obs_dim:                       # zero cols meet zero weight rows
        x = jnp.pad(x, ((0, 0), (0, obs_pad - obs_dim)))

    # Batch tiling: big blocks amortize per-step overhead on single-TC chips
    # (v5e/v6e); for batch > 8 aim for >=2 blocks so both TensorCores of a
    # megacore-style part (v7x) get work (extra step is noise on 1-TC chips).
    if batch <= 8:
        bb = batch
    else:
        bb = min(MAX_BATCH_BLOCK, _round_up(pl.cdiv(batch, 2), 8))
    pb = pl.cdiv(batch, bb) * bb
    if pb != batch:
        # Padded rows run through LN on zeros (eps keeps them finite) and are
        # sliced off below -- do not remove the [:batch] slice.
        x = jnp.pad(x, ((0, pb - batch), (0, 0)))
    grid = (pb // bb,)

    # Grid-invariant parameter slabs: single-buffer when supported (caller falls
    # back to default double-buffered specs otherwise).
    if param_buffer_count:
        mode = pl.Buffered(param_buffer_count)
        w_spec = pl.BlockSpec(w_slab.shape, lambda i: (0, 0), pipeline_mode=mode)
        v_spec = pl.BlockSpec(vec_slab.shape, lambda i: (0, 0), pipeline_mode=mode)
    else:
        w_spec = pl.BlockSpec(w_slab.shape, lambda i: (0, 0))
        v_spec = pl.BlockSpec(vec_slab.shape, lambda i: (0, 0))

    # VMEM budget: only raise the scoped limit when the footprint demands it
    # (v7x physical VMEM is 64 MiB; default scoped limit ~32 MiB everywhere).
    nbuf = param_buffer_count if param_buffer_count else 2
    need = 4 * (2 * bb * (obs_pad + L) + nbuf * (w_slab.size + vec_slab.size)) + (2 << 20)
    vmem_limit = int(min(need, 96 << 20)) if need > (24 << 20) else None

    out = pl.pallas_call(
        _make_fused_kernel(feats, obs_pad, F),
        out_shape=jax.ShapeDtypeStruct((pb, L), jnp.float32),
        grid=grid,
        in_specs=[pl.BlockSpec((bb, obs_pad), lambda i: (i, 0)), w_spec, v_spec],
        out_specs=pl.BlockSpec((bb, L), lambda i: (i, 0)),
        compiler_params=pltpu.CompilerParams(
            dimension_semantics=("parallel",),
            vmem_limit_bytes=vmem_limit),
    )(x, w_slab, vec_slab)

    logits = out[:batch, :action_dim]
    value = out[:batch, action_dim:action_dim + 1]
    return logits, value


# ------------------------------ reference ----------------------------------- #

def _ref_forward(params, x):
    def trunk(h, layers):
        for (w, b, g, bt) in layers:
            y = h @ w + b
            m = jnp.mean(y, axis=-1, keepdims=True)
            v = jnp.mean(jnp.square(y - m), axis=-1, keepdims=True)
            y = (y - m) / jnp.sqrt(v + LN_EPS) * g + bt
            h = jnp.maximum(y, 0.0)
        return h

    ha = trunk(x, params["actor_layers"])
    hc = trunk(x, params["critic_layers"])
    wl, bl = params["actor_head"]
    wv, bv = params["critic_head"]
    return ha @ wl + bl, hc @ wv + bv


# -------------------------------- main -------------------------------------- #

if __name__ == "__main__":
    observation_dim = 16
    action_dim = 4
    features = [32, 32, 32]
    batch = 8

    key = jax.random.PRNGKey(0)
    key, pkey, xkey = jax.random.split(key, 3)

    params = init_rl_agent_params(pkey, observation_dim, action_dim, features)
    packed = pack_rl_agent_params(params)
    x = jax.random.normal(xkey, (batch, observation_dim), jnp.float32)

    ref_logits, ref_value = _ref_forward(params, x)

    def run_and_check(buffer_count):
        fwd = jax.jit(functools.partial(
            rl_agent_forward,
            feats=packed["feats"],
            action_dim=packed["action_dim"],
            param_buffer_count=buffer_count))
        lo, va = fwd(packed["w"], packed["vec"], x)
        lo = jax.block_until_ready(lo)
        va = jax.block_until_ready(va)
        assert lo.shape == (batch, action_dim), lo.shape
        assert va.shape == (batch, 1), va.shape
        assert jnp.allclose(lo, ref_logits, atol=1e-4, rtol=1e-4)
        assert jnp.allclose(va, ref_value, atol=1e-4, rtol=1e-4)
        return lo, va

    try:
        # Preferred path: grid-invariant parameter slabs single-buffered.
        logits, value = run_and_check(1)
    except Exception:
        # TODO(synk): pipeline_mode=pl.Buffered(1) not supported by this JAX/Mosaic
        # build -- fall back to default double-buffered parameter BlockSpecs.
        logits, value = run_and_check(0)

    print("KERNEL_OK")
</pallas_src>

<mosaic_0001>
module attributes {stable_mosaic.version = 11 : i64} {
  func.func @kernel(%arg0: i32, %arg1: memref<8x16xf32, #tpu.memory_space<vmem>>, %arg2: memref<272x64xf32, #tpu.memory_space<vmem>>, %arg3: memref<13x64xf32, #tpu.memory_space<vmem>>, %arg4: memref<8x64xf32, #tpu.memory_space<vmem>>) attributes {dimension_semantics = [#tpu.dimension_semantics<parallel>], iteration_bounds = array<i64: 1>, scalar_prefetch = 0 : i64, scratch_operands = 0 : i64, tpu.core_type = #tpu.core_type<tc>, window_params = [{transform_indices = @transform_0, window_bounds = array<i64: 8, 16>}, {pipeline_mode = #tpu.pipeline_mode<synchronous>, transform_indices = @transform_1, window_bounds = array<i64: 272, 64>}, {pipeline_mode = #tpu.pipeline_mode<synchronous>, transform_indices = @transform_2, window_bounds = array<i64: 13, 64>}, {transform_indices = @transform_3, window_bounds = array<i64: 8, 64>}]} {
    %0 = tpu.iota {dimensions = array<i32: 1>} : vector<1x64xi32>
    %c32_i32 = arith.constant 32 : i32
    %1 = vector.broadcast %c32_i32 : i32 to vector<1x64xi32>
    %2 = arith.cmpi slt, %0, %1 : vector<1x64xi32>
    %c16_i32 = arith.constant 16 : i32
    %3 = vector.broadcast %c16_i32 : i32 to vector<1x64xi32>
    %4 = arith.cmpi slt, %0, %3 : vector<1x64xi32>
    %c32_i32_0 = arith.constant 32 : i32
    %5 = vector.broadcast %c32_i32_0 : i32 to vector<1x64xi32>
    %6 = arith.cmpi sge, %0, %5 : vector<1x64xi32>
    %c48_i32 = arith.constant 48 : i32
    %7 = vector.broadcast %c48_i32 : i32 to vector<1x64xi32>
    %8 = arith.cmpi slt, %0, %7 : vector<1x64xi32>
    %9 = arith.andi %6, %8 : vector<1x64xi1>
    %10 = arith.ori %4, %9 : vector<1x64xi1>
    %c0 = arith.constant 0 : index
    %c0_1 = arith.constant 0 : index
    %11 = vector.load %arg1[%c0, %c0_1] : memref<8x16xf32, #tpu.memory_space<vmem>>, vector<8x16xf32>
    %c0_2 = arith.constant 0 : index
    %c0_3 = arith.constant 0 : index
    %12 = vector.load %arg2[%c0_2, %c0_3] : memref<272x64xf32, #tpu.memory_space<vmem>>, vector<16x64xf32>
    %c0_4 = arith.constant 0 : index
    %c0_5 = arith.constant 0 : index
    %13 = vector.load %arg3[%c0_4, %c0_5] : memref<13x64xf32, #tpu.memory_space<vmem>>, vector<1x64xf32>
    %c1 = arith.constant 1 : index
    %c0_6 = arith.constant 0 : index
    %14 = vector.load %arg3[%c1, %c0_6] : memref<13x64xf32, #tpu.memory_space<vmem>>, vector<1x64xf32>
    %c2 = arith.constant 2 : index
    %c0_7 = arith.constant 0 : index
    %15 = vector.load %arg3[%c2, %c0_7] : memref<13x64xf32, #tpu.memory_space<vmem>>, vector<1x64xf32>
    %cst = arith.constant dense<0.000000e+00> : vector<8x64xf32>
    %16 = tpu.matmul %11, %12, %cst {dimension_numbers = #tpu.dot_dimension_numbers<[1], [0], [0], [1], [0, 0, 1, 1], [], []>} : vector<8x16xf32>, vector<16x64xf32>, vector<8x64xf32> -> vector<8x64xf32>
    %17 = vector.broadcast %13 : vector<1x64xf32> to vector<8x64xf32>
    %18 = arith.addf %16, %17 : vector<8x64xf32>
    %cst_8 = arith.constant dense<0.000000e+00> : vector<8xf32>
    %19 = vector.multi_reduction <add>, %18, %cst_8 [1] : vector<8x64xf32> to vector<8xf32>
    %20 = vector.shape_cast %19 : vector<8xf32> to vector<8x1xf32>
    %cst_9 = arith.constant 0.000000e+00 : f32
    %21 = vector.shape_cast %2 : vector<1x64xi1> to vector<1x64xi1>
    %22 = vector.broadcast %21 : vector<1x64xi1> to vector<8x64xi1>
    %23 = vector.broadcast %cst_9 : f32 to vector<8x64xf32>
    %24 = arith.select %22, %18, %23 : vector<8x64xi1>, vector<8x64xf32>
    %cst_10 = arith.constant dense<0.000000e+00> : vector<8xf32>
    %25 = vector.multi_reduction <add>, %24, %cst_10 [1] : vector<8x64xf32> to vector<8xf32>
    %26 = vector.shape_cast %25 : vector<8xf32> to vector<8x1xf32>
    %27 = arith.subf %20, %26 : vector<8x1xf32>
    %28 = vector.shape_cast %2 : vector<1x64xi1> to vector<1x64xi1>
    %29 = vector.broadcast %28 : vector<1x64xi1> to vector<8x64xi1>
    %30 = vector.shape_cast %26 : vector<8x1xf32> to vector<8x1xf32>
    %31 = vector.broadcast %30 : vector<8x1xf32> to vector<8x64xf32>
    %32 = vector.shape_cast %27 : vector<8x1xf32> to vector<8x1xf32>
    %33 = vector.broadcast %32 : vector<8x1xf32> to vector<8x64xf32>
    %34 = arith.select %29, %31, %33 : vector<8x64xi1>, vector<8x64xf32>
    %cst_11 = arith.constant 6.250000e-02 : f32
    %35 = vector.broadcast %cst_11 : f32 to vector<8x64xf32>
    %36 = arith.mulf %34, %35 : vector<8x64xf32>
    %37 = arith.subf %18, %36 : vector<8x64xf32>
    %38 = arith.mulf %37, %37 : vector<8x64xf32>
    %cst_12 = arith.constant 0.000000e+00 : f32
    %39 = vector.shape_cast %10 : vector<1x64xi1> to vector<1x64xi1>
    %40 = vector.broadcast %39 : vector<1x64xi1> to vector<8x64xi1>
    %41 = vector.broadcast %cst_12 : f32 to vector<8x64xf32>
    %42 = arith.select %40, %38, %41 : vector<8x64xi1>, vector<8x64xf32>
    %cst_13 = arith.constant dense<0.000000e+00> : vector<8xf32>
    %43 = vector.multi_reduction <add>, %42, %cst_13 [1] : vector<8x64xf32> to vector<8xf32>
    %44 = vector.shape_cast %43 : vector<8xf32> to vector<8x1xf32>
    %cst_14 = arith.constant 0.000000e+00 : f32
    %45 = vector.shape_cast %2 : vector<1x64xi1> to vector<1x64xi1>
    %46 = vector.broadcast %45 : vector<1x64xi1> to vector<8x64xi1>
    %47 = vector.broadcast %cst_14 : f32 to vector<8x64xf32>
    %48 = arith.select %46, %42, %47 : vector<8x64xi1>, vector<8x64xf32>
    %cst_15 = arith.constant dense<0.000000e+00> : vector<8xf32>
    %49 = vector.multi_reduction <add>, %48, %cst_15 [1] : vector<8x64xf32> to vector<8xf32>
    %50 = vector.shape_cast %49 : vector<8xf32> to vector<8x1xf32>
    %51 = arith.subf %44, %50 : vector<8x1xf32>
    %52 = vector.shape_cast %2 : vector<1x64xi1> to vector<1x64xi1>
    %53 = vector.broadcast %52 : vector<1x64xi1> to vector<8x64xi1>
    %54 = vector.shape_cast %50 : vector<8x1xf32> to vector<8x1xf32>
    %55 = vector.broadcast %54 : vector<8x1xf32> to vector<8x64xf32>
    %56 = vector.shape_cast %51 : vector<8x1xf32> to vector<8x1xf32>
    %57 = vector.broadcast %56 : vector<8x1xf32> to vector<8x64xf32>
    %58 = arith.select %53, %55, %57 : vector<8x64xi1>, vector<8x64xf32>
    %cst_16 = arith.constant 6.250000e-02 : f32
    %59 = vector.broadcast %cst_16 : f32 to vector<8x64xf32>
    %60 = arith.mulf %58, %59 : vector<8x64xf32>
    %cst_17 = arith.constant 9.99999974E-6 : f32
    %61 = vector.broadcast %cst_17 : f32 to vector<8x64xf32>
    %62 = arith.addf %60, %61 : vector<8x64xf32>
    %63 = math.rsqrt %62 : vector<8x64xf32>
    %64 = arith.mulf %37, %63 : vector<8x64xf32>
    %65 = vector.broadcast %14 : vector<1x64xf32> to vector<8x64xf32>
    %66 = arith.mulf %64, %65 : vector<8x64xf32>
    %67 = vector.broadcast %15 : vector<1x64xf32> to vector<8x64xf32>
    %68 = arith.addf %66, %67 : vector<8x64xf32>
    %cst_18 = arith.constant 0.000000e+00 : f32
    %69 = vector.broadcast %cst_18 : f32 to vector<8x64xf32>
    %70 = arith.maximumf %68, %69 : vector<8x64xf32>
    %c16 = arith.constant 16 : index
    %c0_19 = arith.constant 0 : index
    %71 = vector.load %arg2[%c16, %c0_19] : memref<272x64xf32, #tpu.memory_space<vmem>>, vector<64x64xf32>
    %c3 = arith.constant 3 : index
    %c0_20 = arith.constant 0 : index
    %72 = vector.load %arg3[%c3, %c0_20] : memref<13x64xf32, #tpu.memory_space<vmem>>, vector<1x64xf32>
    %c4 = arith.constant 4 : index
    %c0_21 = arith.constant 0 : index
    %73 = vector.load %arg3[%c4, %c0_21] : memref<13x64xf32, #tpu.memory_space<vmem>>, vector<1x64xf32>
    %c5 = arith.constant 5 : index
    %c0_22 = arith.constant 0 : index
    %74 = vector.load %arg3[%c5, %c0_22] : memref<13x64xf32, #tpu.memory_space<vmem>>, vector<1x64xf32>
    %cst_23 = arith.constant dense<0.000000e+00> : vector<8x64xf32>
    %75 = tpu.matmul %70, %71, %cst_23 {dimension_numbers = #tpu.dot_dimension_numbers<[1], [0], [0], [1], [0, 0, 1, 1], [], []>} : vector<8x64xf32>, vector<64x64xf32>, vector<8x64xf32> -> vector<8x64xf32>
    %76 = vector.broadcast %72 : vector<1x64xf32> to vector<8x64xf32>
    %77 = arith.addf %75, %76 : vector<8x64xf32>
    %cst_24 = arith.constant dense<0.000000e+00> : vector<8xf32>
    %78 = vector.multi_reduction <add>, %77, %cst_24 [1] : vector<8x64xf32> to vector<8xf32>
    %79 = vector.shape_cast %78 : vector<8xf32> to vector<8x1xf32>
    %cst_25 = arith.constant 0.000000e+00 : f32
    %80 = vector.shape_cast %2 : vector<1x64xi1> to vector<1x64xi1>
    %81 = vector.broadcast %80 : vector<1x64xi1> to vector<8x64xi1>
    %82 = vector.broadcast %cst_25 : f32 to vector<8x64xf32>
    %83 = arith.select %81, %77, %82 : vector<8x64xi1>, vector<8x64xf32>
    %cst_26 = arith.constant dense<0.000000e+00> : vector<8xf32>
    %84 = vector.multi_reduction <add>, %83, %cst_26 [1] : vector<8x64xf32> to vector<8xf32>
    %85 = vector.shape_cast %84 : vector<8xf32> to vector<8x1xf32>
    %86 = arith.subf %79, %85 : vector<8x1xf32>
    %87 = vector.shape_cast %2 : vector<1x64xi1> to vector<1x64xi1>
    %88 = vector.broadcast %87 : vector<1x64xi1> to vector<8x64xi1>
    %89 = vector.shape_cast %85 : vector<8x1xf32> to vector<8x1xf32>
    %90 = vector.broadcast %89 : vector<8x1xf32> to vector<8x64xf32>
    %91 = vector.shape_cast %86 : vector<8x1xf32> to vector<8x1xf32>
    %92 = vector.broadcast %91 : vector<8x1xf32> to vector<8x64xf32>
    %93 = arith.select %88, %90, %92 : vector<8x64xi1>, vector<8x64xf32>
    %cst_27 = arith.constant 3.125000e-02 : f32
    %94 = vector.broadcast %cst_27 : f32 to vector<8x64xf32>
    %95 = arith.mulf %93, %94 : vector<8x64xf32>
    %96 = arith.subf %77, %95 : vector<8x64xf32>
    %97 = arith.mulf %96, %96 : vector<8x64xf32>
    %cst_28 = arith.constant dense<0.000000e+00> : vector<8xf32>
    %98 = vector.multi_reduction <add>, %97, %cst_28 [1] : vector<8x64xf32> to vector<8xf32>
    %99 = vector.shape_cast %98 : vector<8xf32> to vector<8x1xf32>
    %cst_29 = arith.constant 0.000000e+00 : f32
    %100 = vector.shape_cast %2 : vector<1x64xi1> to vector<1x64xi1>
    %101 = vector.broadcast %100 : vector<1x64xi1> to vector<8x64xi1>
    %102 = vector.broadcast %cst_29 : f32 to vector<8x64xf32>
    %103 = arith.select %101, %97, %102 : vector<8x64xi1>, vector<8x64xf32>
    %cst_30 = arith.constant dense<0.000000e+00> : vector<8xf32>
    %104 = vector.multi_reduction <add>, %103, %cst_30 [1] : vector<8x64xf32> to vector<8xf32>
    %105 = vector.shape_cast %104 : vector<8xf32> to vector<8x1xf32>
    %106 = arith.subf %99, %105 : vector<8x1xf32>
    %107 = vector.shape_cast %2 : vector<1x64xi1> to vector<1x64xi1>
    %108 = vector.broadcast %107 : vector<1x64xi1> to vector<8x64xi1>
    %109 = vector.shape_cast %105 : vector<8x1xf32> to vector<8x1xf32>
    %110 = vector.broadcast %109 : vector<8x1xf32> to vector<8x64xf32>
    %111 = vector.shape_cast %106 : vector<8x1xf32> to vector<8x1xf32>
    %112 = vector.broadcast %111 : vector<8x1xf32> to vector<8x64xf32>
    %113 = arith.select %108, %110, %112 : vector<8x64xi1>, vector<8x64xf32>
    %cst_31 = arith.constant 3.125000e-02 : f32
    %114 = vector.broadcast %cst_31 : f32 to vector<8x64xf32>
    %115 = arith.mulf %113, %114 : vector<8x64xf32>
    %cst_32 = arith.constant 9.99999974E-6 : f32
    %116 = vector.broadcast %cst_32 : f32 to vector<8x64xf32>
    %117 = arith.addf %115, %116 : vector<8x64xf32>
    %118 = math.rsqrt %117 : vector<8x64xf32>
    %119 = arith.mulf %96, %118 : vector<8x64xf32>
    %120 = vector.broadcast %73 : vector<1x64xf32> to vector<8x64xf32>
    %121 = arith.mulf %119, %120 : vector<8x64xf32>
    %122 = vector.broadcast %74 : vector<1x64xf32> to vector<8x64xf32>
    %123 = arith.addf %121, %122 : vector<8x64xf32>
    %cst_33 = arith.constant 0.000000e+00 : f32
    %124 = vector.broadcast %cst_33 : f32 to vector<8x64xf32>
    %125 = arith.maximumf %123, %124 : vector<8x64xf32>
    %c80 = arith.constant 80 : index
    %c0_34 = arith.constant 0 : index
    %126 = vector.load %arg2[%c80, %c0_34] : memref<272x64xf32, #tpu.memory_space<vmem>>, vector<64x64xf32>
    %c6 = arith.constant 6 : index
    %c0_35 = arith.constant 0 : index
    %127 = vector.load %arg3[%c6, %c0_35] : memref<13x64xf32, #tpu.memory_space<vmem>>, vector<1x64xf32>
    %c7 = arith.constant 7 : index
    %c0_36 = arith.constant 0 : index
    %128 = vector.load %arg3[%c7, %c0_36] : memref<13x64xf32, #tpu.memory_space<vmem>>, vector<1x64xf32>
    %c8 = arith.constant 8 : index
    %c0_37 = arith.constant 0 : index
    %129 = vector.load %arg3[%c8, %c0_37] : memref<13x64xf32, #tpu.memory_space<vmem>>, vector<1x64xf32>
    %cst_38 = arith.constant dense<0.000000e+00> : vector<8x64xf32>
    %130 = tpu.matmul %125, %126, %cst_38 {dimension_numbers = #tpu.dot_dimension_numbers<[1], [0], [0], [1], [0, 0, 1, 1], [], []>} : vector<8x64xf32>, vector<64x64xf32>, vector<8x64xf32> -> vector<8x64xf32>
    %131 = vector.broadcast %127 : vector<1x64xf32> to vector<8x64xf32>
    %132 = arith.addf %130, %131 : vector<8x64xf32>
    %cst_39 = arith.constant dense<0.000000e+00> : vector<8xf32>
    %133 = vector.multi_reduction <add>, %132, %cst_39 [1] : vector<8x64xf32> to vector<8xf32>
    %134 = vector.shape_cast %133 : vector<8xf32> to vector<8x1xf32>
    %cst_40 = arith.constant 0.000000e+00 : f32
    %135 = vector.shape_cast %2 : vector<1x64xi1> to vector<1x64xi1>
    %136 = vector.broadcast %135 : vector<1x64xi1> to vector<8x64xi1>
    %137 = vector.broadcast %cst_40 : f32 to vector<8x64xf32>
    %138 = arith.select %136, %132, %137 : vector<8x64xi1>, vector<8x64xf32>
    %cst_41 = arith.constant dense<0.000000e+00> : vector<8xf32>
    %139 = vector.multi_reduction <add>, %138, %cst_41 [1] : vector<8x64xf32> to vector<8xf32>
    %140 = vector.shape_cast %139 : vector<8xf32> to vector<8x1xf32>
    %141 = arith.subf %134, %140 : vector<8x1xf32>
    %142 = vector.shape_cast %2 : vector<1x64xi1> to vector<1x64xi1>
    %143 = vector.broadcast %142 : vector<1x64xi1> to vector<8x64xi1>
    %144 = vector.shape_cast %140 : vector<8x1xf32> to vector<8x1xf32>
    %145 = vector.broadcast %144 : vector<8x1xf32> to vector<8x64xf32>
    %146 = vector.shape_cast %141 : vector<8x1xf32> to vector<8x1xf32>
    %147 = vector.broadcast %146 : vector<8x1xf32> to vector<8x64xf32>
    %148 = arith.select %143, %145, %147 : vector<8x64xi1>, vector<8x64xf32>
    %cst_42 = arith.constant 3.125000e-02 : f32
    %149 = vector.broadcast %cst_42 : f32 to vector<8x64xf32>
    %150 = arith.mulf %148, %149 : vector<8x64xf32>
    %151 = arith.subf %132, %150 : vector<8x64xf32>
    %152 = arith.mulf %151, %151 : vector<8x64xf32>
    %cst_43 = arith.constant dense<0.000000e+00> : vector<8xf32>
    %153 = vector.multi_reduction <add>, %152, %cst_43 [1] : vector<8x64xf32> to vector<8xf32>
    %154 = vector.shape_cast %153 : vector<8xf32> to vector<8x1xf32>
    %cst_44 = arith.constant 0.000000e+00 : f32
    %155 = vector.shape_cast %2 : vector<1x64xi1> to vector<1x64xi1>
    %156 = vector.broadcast %155 : vector<1x64xi1> to vector<8x64xi1>
    %157 = vector.broadcast %cst_44 : f32 to vector<8x64xf32>
    %158 = arith.select %156, %152, %157 : vector<8x64xi1>, vector<8x64xf32>
    %cst_45 = arith.constant dense<0.000000e+00> : vector<8xf32>
    %159 = vector.multi_reduction <add>, %158, %cst_45 [1] : vector<8x64xf32> to vector<8xf32>
    %160 = vector.shape_cast %159 : vector<8xf32> to vector<8x1xf32>
    %161 = arith.subf %154, %160 : vector<8x1xf32>
    %162 = vector.shape_cast %2 : vector<1x64xi1> to vector<1x64xi1>
    %163 = vector.broadcast %162 : vector<1x64xi1> to vector<8x64xi1>
    %164 = vector.shape_cast %160 : vector<8x1xf32> to vector<8x1xf32>
    %165 = vector.broadcast %164 : vector<8x1xf32> to vector<8x64xf32>
    %166 = vector.shape_cast %161 : vector<8x1xf32> to vector<8x1xf32>
    %167 = vector.broadcast %166 : vector<8x1xf32> to vector<8x64xf32>
    %168 = arith.select %163, %165, %167 : vector<8x64xi1>, vector<8x64xf32>
    %cst_46 = arith.constant 3.125000e-02 : f32
    %169 = vector.broadcast %cst_46 : f32 to vector<8x64xf32>
    %170 = arith.mulf %168, %169 : vector<8x64xf32>
    %cst_47 = arith.constant 9.99999974E-6 : f32
    %171 = vector.broadcast %cst_47 : f32 to vector<8x64xf32>
    %172 = arith.addf %170, %171 : vector<8x64xf32>
    %173 = math.rsqrt %172 : vector<8x64xf32>
    %174 = arith.mulf %151, %173 : vector<8x64xf32>
    %175 = vector.broadcast %128 : vector<1x64xf32> to vector<8x64xf32>
    %176 = arith.mulf %174, %175 : vector<8x64xf32>
    %177 = vector.broadcast %129 : vector<1x64xf32> to vector<8x64xf32>
    %178 = arith.addf %176, %177 : vector<8x64xf32>
    %cst_48 = arith.constant 0.000000e+00 : f32
    %179 = vector.broadcast %cst_48 : f32 to vector<8x64xf32>
    %180 = arith.maximumf %178, %179 : vector<8x64xf32>
    %c144 = arith.constant 144 : index
    %c0_49 = arith.constant 0 : index
    %181 = vector.load %arg2[%c144, %c0_49] : memref<272x64xf32, #tpu.memory_space<vmem>>, vector<64x64xf32>
    %c9 = arith.constant 9 : index
    %c0_50 = arith.constant 0 : index
    %182 = vector.load %arg3[%c9, %c0_50] : memref<13x64xf32, #tpu.memory_space<vmem>>, vector<1x64xf32>
    %c10 = arith.constant 10 : index
    %c0_51 = arith.constant 0 : index
    %183 = vector.load %arg3[%c10, %c0_51] : memref<13x64xf32, #tpu.memory_space<vmem>>, vector<1x64xf32>
    %c11 = arith.constant 11 : index
    %c0_52 = arith.constant 0 : index
    %184 = vector.load %arg3[%c11, %c0_52] : memref<13x64xf32, #tpu.memory_space<vmem>>, vector<1x64xf32>
    %cst_53 = arith.constant dense<0.000000e+00> : vector<8x64xf32>
    %185 = tpu.matmul %180, %181, %cst_53 {dimension_numbers = #tpu.dot_dimension_numbers<[1], [0], [0], [1], [0, 0, 1, 1], [], []>} : vector<8x64xf32>, vector<64x64xf32>, vector<8x64xf32> -> vector<8x64xf32>
    %186 = vector.broadcast %182 : vector<1x64xf32> to vector<8x64xf32>
    %187 = arith.addf %185, %186 : vector<8x64xf32>
    %cst_54 = arith.constant dense<0.000000e+00> : vector<8xf32>
    %188 = vector.multi_reduction <add>, %187, %cst_54 [1] : vector<8x64xf32> to vector<8xf32>
    %189 = vector.shape_cast %188 : vector<8xf32> to vector<8x1xf32>
    %cst_55 = arith.constant 0.000000e+00 : f32
    %190 = vector.shape_cast %2 : vector<1x64xi1> to vector<1x64xi1>
    %191 = vector.broadcast %190 : vector<1x64xi1> to vector<8x64xi1>
    %192 = vector.broadcast %cst_55 : f32 to vector<8x64xf32>
    %193 = arith.select %191, %187, %192 : vector<8x64xi1>, vector<8x64xf32>
    %cst_56 = arith.constant dense<0.000000e+00> : vector<8xf32>
    %194 = vector.multi_reduction <add>, %193, %cst_56 [1] : vector<8x64xf32> to vector<8xf32>
    %195 = vector.shape_cast %194 : vector<8xf32> to vector<8x1xf32>
    %196 = arith.subf %189, %195 : vector<8x1xf32>
    %197 = vector.shape_cast %2 : vector<1x64xi1> to vector<1x64xi1>
    %198 = vector.broadcast %197 : vector<1x64xi1> to vector<8x64xi1>
    %199 = vector.shape_cast %195 : vector<8x1xf32> to vector<8x1xf32>
    %200 = vector.broadcast %199 : vector<8x1xf32> to vector<8x64xf32>
    %201 = vector.shape_cast %196 : vector<8x1xf32> to vector<8x1xf32>
    %202 = vector.broadcast %201 : vector<8x1xf32> to vector<8x64xf32>
    %203 = arith.select %198, %200, %202 : vector<8x64xi1>, vector<8x64xf32>
    %cst_57 = arith.constant 3.125000e-02 : f32
    %204 = vector.broadcast %cst_57 : f32 to vector<8x64xf32>
    %205 = arith.mulf %203, %204 : vector<8x64xf32>
    %206 = arith.subf %187, %205 : vector<8x64xf32>
    %207 = arith.mulf %206, %206 : vector<8x64xf32>
    %cst_58 = arith.constant dense<0.000000e+00> : vector<8xf32>
    %208 = vector.multi_reduction <add>, %207, %cst_58 [1] : vector<8x64xf32> to vector<8xf32>
    %209 = vector.shape_cast %208 : vector<8xf32> to vector<8x1xf32>
    %cst_59 = arith.constant 0.000000e+00 : f32
    %210 = vector.shape_cast %2 : vector<1x64xi1> to vector<1x64xi1>
    %211 = vector.broadcast %210 : vector<1x64xi1> to vector<8x64xi1>
    %212 = vector.broadcast %cst_59 : f32 to vector<8x64xf32>
    %213 = arith.select %211, %207, %212 : vector<8x64xi1>, vector<8x64xf32>
    %cst_60 = arith.constant dense<0.000000e+00> : vector<8xf32>
    %214 = vector.multi_reduction <add>, %213, %cst_60 [1] : vector<8x64xf32> to vector<8xf32>
    %215 = vector.shape_cast %214 : vector<8xf32> to vector<8x1xf32>
    %216 = arith.subf %209, %215 : vector<8x1xf32>
    %217 = vector.shape_cast %2 : vector<1x64xi1> to vector<1x64xi1>
    %218 = vector.broadcast %217 : vector<1x64xi1> to vector<8x64xi1>
    %219 = vector.shape_cast %215 : vector<8x1xf32> to vector<8x1xf32>
    %220 = vector.broadcast %219 : vector<8x1xf32> to vector<8x64xf32>
    %221 = vector.shape_cast %216 : vector<8x1xf32> to vector<8x1xf32>
    %222 = vector.broadcast %221 : vector<8x1xf32> to vector<8x64xf32>
    %223 = arith.select %218, %220, %222 : vector<8x64xi1>, vector<8x64xf32>
    %cst_61 = arith.constant 3.125000e-02 : f32
    %224 = vector.broadcast %cst_61 : f32 to vector<8x64xf32>
    %225 = arith.mulf %223, %224 : vector<8x64xf32>
    %cst_62 = arith.constant 9.99999974E-6 : f32
    %226 = vector.broadcast %cst_62 : f32 to vector<8x64xf32>
    %227 = arith.addf %225, %226 : vector<8x64xf32>
    %228 = math.rsqrt %227 : vector<8x64xf32>
    %229 = arith.mulf %206, %228 : vector<8x64xf32>
    %230 = vector.broadcast %183 : vector<1x64xf32> to vector<8x64xf32>
    %231 = arith.mulf %229, %230 : vector<8x64xf32>
    %232 = vector.broadcast %184 : vector<1x64xf32> to vector<8x64xf32>
    %233 = arith.addf %231, %232 : vector<8x64xf32>
    %cst_63 = arith.constant 0.000000e+00 : f32
    %234 = vector.broadcast %cst_63 : f32 to vector<8x64xf32>
    %235 = arith.maximumf %233, %234 : vector<8x64xf32>
    %c208 = arith.constant 208 : index
    %c0_64 = arith.constant 0 : index
    %236 = vector.load %arg2[%c208, %c0_64] : memref<272x64xf32, #tpu.memory_space<vmem>>, vector<64x64xf32>
    %c12 = arith.constant 12 : index
    %c0_65 = arith.constant 0 : index
    %237 = vector.load %arg3[%c12, %c0_65] : memref<13x64xf32, #tpu.memory_space<vmem>>, vector<1x64xf32>
    %cst_66 = arith.constant dense<0.000000e+00> : vector<8x64xf32>
    %238 = tpu.matmul %235, %236, %cst_66 {dimension_numbers = #tpu.dot_dimension_numbers<[1], [0], [0], [1], [0, 0, 1, 1], [], []>} : vector<8x64xf32>, vector<64x64xf32>, vector<8x64xf32> -> vector<8x64xf32>
    %239 = vector.broadcast %237 : vector<1x64xf32> to vector<8x64xf32>
    %240 = arith.addf %238, %239 : vector<8x64xf32>
    %c0_67 = arith.constant 0 : index
    %c0_68 = arith.constant 0 : index
    %241 = vector.load %arg4[%c0_67, %c0_68] : memref<8x64xf32, #tpu.memory_space<vmem>>, vector<8x64xf32>
    tpu.vector_store %arg4[%c0_67, %c0_68], %240 {strides = array<i32>} : memref<8x64xf32, #tpu.memory_space<vmem>>, vector<8x64xf32>,
    return
  }
  func.func @transform_0(%arg0: i32) -> (i32, i32) {
    %c0_i32 = arith.constant 0 : i32
    %c0_i32_0 = arith.constant 0 : i32
    return %arg0, %c0_i32 : i32, i32
  }
  func.func @transform_1(%arg0: i32) -> (i32, i32) {
    %c0_i32 = arith.constant 0 : i32
    %c0_i32_0 = arith.constant 0 : i32
    %c0_i32_1 = arith.constant 0 : i32
    return %c0_i32, %c0_i32_0 : i32, i32
  }
  func.func @transform_2(%arg0: i32) -> (i32, i32) {
    %c0_i32 = arith.constant 0 : i32
    %c0_i32_0 = arith.constant 0 : i32
    %c0_i32_1 = arith.constant 0 : i32
    return %c0_i32, %c0_i32_0 : i32, i32
  }
  func.func @transform_3(%arg0: i32) -> (i32, i32) {
    %c0_i32 = arith.constant 0 : i32
    %c0_i32_0 = arith.constant 0 : i32
    return %arg0, %c0_i32 : i32, i32
  }
}

module attributes {stable_mosaic.version = 11 : i64} {
  func.func @kernel(%arg0: i32, %arg1: memref<8x16xf32, #tpu.memory_space<vmem>>, %arg2: memref<272x64xf32, #tpu.memory_space<vmem>>, %arg3: memref<13x64xf32, #tpu.memory_space<vmem>>, %arg4: memref<8x64xf32, #tpu.memory_space<vmem>>) attributes {dimension_semantics = [#tpu.dimension_semantics<parallel>], iteration_bounds = array<i64: 1>, scalar_prefetch = 0 : i64, scratch_operands = 0 : i64, tpu.core_type = #tpu.core_type<tc>, window_params = [{transform_indices = @transform_0, window_bounds = array<i64: 8, 16>}, {pipeline_mode = #tpu.pipeline_mode<synchronous>, transform_indices = @transform_1, window_bounds = array<i64: 272, 64>}, {pipeline_mode = #tpu.pipeline_mode<synchronous>, transform_indices = @transform_2, window_bounds = array<i64: 13, 64>}, {transform_indices = @transform_3, window_bounds = array<i64: 8, 64>}]} {
    %0 = tpu.iota {dimensions = array<i32: 1>} : vector<1x64xi32>
    %c32_i32 = arith.constant 32 : i32
    %1 = vector.broadcast %c32_i32 : i32 to vector<1x64xi32>
    %2 = arith.cmpi slt, %0, %1 : vector<1x64xi32>
    %c16_i32 = arith.constant 16 : i32
    %3 = vector.broadcast %c16_i32 : i32 to vector<1x64xi32>
    %4 = arith.cmpi slt, %0, %3 : vector<1x64xi32>
    %c32_i32_0 = arith.constant 32 : i32
    %5 = vector.broadcast %c32_i32_0 : i32 to vector<1x64xi32>
    %6 = arith.cmpi sge, %0, %5 : vector<1x64xi32>
    %c48_i32 = arith.constant 48 : i32
    %7 = vector.broadcast %c48_i32 : i32 to vector<1x64xi32>
    %8 = arith.cmpi slt, %0, %7 : vector<1x64xi32>
    %9 = arith.andi %6, %8 : vector<1x64xi1>
    %10 = arith.ori %4, %9 : vector<1x64xi1>
    %c0 = arith.constant 0 : index
    %c0_1 = arith.constant 0 : index
    %11 = vector.load %arg1[%c0, %c0_1] : memref<8x16xf32, #tpu.memory_space<vmem>>, vector<8x16xf32>
    %c0_2 = arith.constant 0 : index
    %c0_3 = arith.constant 0 : index
    %12 = vector.load %arg2[%c0_2, %c0_3] : memref<272x64xf32, #tpu.memory_space<vmem>>, vector<16x64xf32>
    %c0_4 = arith.constant 0 : index
    %c0_5 = arith.constant 0 : index
    %13 = vector.load %arg3[%c0_4, %c0_5] : memref<13x64xf32, #tpu.memory_space<vmem>>, vector<1x64xf32>
    %c1 = arith.constant 1 : index
    %c0_6 = arith.constant 0 : index
    %14 = vector.load %arg3[%c1, %c0_6] : memref<13x64xf32, #tpu.memory_space<vmem>>, vector<1x64xf32>
    %c2 = arith.constant 2 : index
    %c0_7 = arith.constant 0 : index
    %15 = vector.load %arg3[%c2, %c0_7] : memref<13x64xf32, #tpu.memory_space<vmem>>, vector<1x64xf32>
    %cst = arith.constant dense<0.000000e+00> : vector<8x64xf32>
    %16 = tpu.matmul %11, %12, %cst {dimension_numbers = #tpu.dot_dimension_numbers<[1], [0], [0], [1], [0, 0, 1, 1], [], []>} : vector<8x16xf32>, vector<16x64xf32>, vector<8x64xf32> -> vector<8x64xf32>
    %17 = vector.broadcast %13 : vector<1x64xf32> to vector<8x64xf32>
    %18 = arith.addf %16, %17 : vector<8x64xf32>
    %cst_8 = arith.constant dense<0.000000e+00> : vector<8xf32>
    %19 = vector.multi_reduction <add>, %18, %cst_8 [1] : vector<8x64xf32> to vector<8xf32>
    %20 = vector.shape_cast %19 : vector<8xf32> to vector<8x1xf32>
    %cst_9 = arith.constant 0.000000e+00 : f32
    %21 = vector.shape_cast %2 : vector<1x64xi1> to vector<1x64xi1>
    %22 = vector.broadcast %21 : vector<1x64xi1> to vector<8x64xi1>
    %23 = vector.broadcast %cst_9 : f32 to vector<8x64xf32>
    %24 = arith.select %22, %18, %23 : vector<8x64xi1>, vector<8x64xf32>
    %cst_10 = arith.constant dense<0.000000e+00> : vector<8xf32>
    %25 = vector.multi_reduction <add>, %24, %cst_10 [1] : vector<8x64xf32> to vector<8xf32>
    %26 = vector.shape_cast %25 : vector<8xf32> to vector<8x1xf32>
    %27 = arith.subf %20, %26 : vector<8x1xf32>
    %28 = vector.shape_cast %2 : vector<1x64xi1> to vector<1x64xi1>
    %29 = vector.broadcast %28 : vector<1x64xi1> to vector<8x64xi1>
    %30 = vector.shape_cast %26 : vector<8x1xf32> to vector<8x1xf32>
    %31 = vector.broadcast %30 : vector<8x1xf32> to vector<8x64xf32>
    %32 = vector.shape_cast %27 : vector<8x1xf32> to vector<8x1xf32>
    %33 = vector.broadcast %32 : vector<8x1xf32> to vector<8x64xf32>
    %34 = arith.select %29, %31, %33 : vector<8x64xi1>, vector<8x64xf32>
    %cst_11 = arith.constant 6.250000e-02 : f32
    %35 = vector.broadcast %cst_11 : f32 to vector<8x64xf32>
    %36 = arith.mulf %34, %35 : vector<8x64xf32>
    %37 = arith.subf %18, %36 : vector<8x64xf32>
    %38 = arith.mulf %37, %37 : vector<8x64xf32>
    %cst_12 = arith.constant 0.000000e+00 : f32
    %39 = vector.shape_cast %10 : vector<1x64xi1> to vector<1x64xi1>
    %40 = vector.broadcast %39 : vector<1x64xi1> to vector<8x64xi1>
    %41 = vector.broadcast %cst_12 : f32 to vector<8x64xf32>
    %42 = arith.select %40, %38, %41 : vector<8x64xi1>, vector<8x64xf32>
    %cst_13 = arith.constant dense<0.000000e+00> : vector<8xf32>
    %43 = vector.multi_reduction <add>, %42, %cst_13 [1] : vector<8x64xf32> to vector<8xf32>
    %44 = vector.shape_cast %43 : vector<8xf32> to vector<8x1xf32>
    %cst_14 = arith.constant 0.000000e+00 : f32
    %45 = vector.shape_cast %2 : vector<1x64xi1> to vector<1x64xi1>
    %46 = vector.broadcast %45 : vector<1x64xi1> to vector<8x64xi1>
    %47 = vector.broadcast %cst_14 : f32 to vector<8x64xf32>
    %48 = arith.select %46, %42, %47 : vector<8x64xi1>, vector<8x64xf32>
    %cst_15 = arith.constant dense<0.000000e+00> : vector<8xf32>
    %49 = vector.multi_reduction <add>, %48, %cst_15 [1] : vector<8x64xf32> to vector<8xf32>
    %50 = vector.shape_cast %49 : vector<8xf32> to vector<8x1xf32>
    %51 = arith.subf %44, %50 : vector<8x1xf32>
    %52 = vector.shape_cast %2 : vector<1x64xi1> to vector<1x64xi1>
    %53 = vector.broadcast %52 : vector<1x64xi1> to vector<8x64xi1>
    %54 = vector.shape_cast %50 : vector<8x1xf32> to vector<8x1xf32>
    %55 = vector.broadcast %54 : vector<8x1xf32> to vector<8x64xf32>
    %56 = vector.shape_cast %51 : vector<8x1xf32> to vector<8x1xf32>
    %57 = vector.broadcast %56 : vector<8x1xf32> to vector<8x64xf32>
    %58 = arith.select %53, %55, %57 : vector<8x64xi1>, vector<8x64xf32>
    %cst_16 = arith.constant 6.250000e-02 : f32
    %59 = vector.broadcast %cst_16 : f32 to vector<8x64xf32>
    %60 = arith.mulf %58, %59 : vector<8x64xf32>
    %cst_17 = arith.constant 9.99999974E-6 : f32
    %61 = vector.broadcast %cst_17 : f32 to vector<8x64xf32>
    %62 = arith.addf %60, %61 : vector<8x64xf32>
    %63 = math.rsqrt %62 : vector<8x64xf32>
    %64 = arith.mulf %37, %63 : vector<8x64xf32>
    %65 = vector.broadcast %14 : vector<1x64xf32> to vector<8x64xf32>
    %66 = arith.mulf %64, %65 : vector<8x64xf32>
    %67 = vector.broadcast %15 : vector<1x64xf32> to vector<8x64xf32>
    %68 = arith.addf %66, %67 : vector<8x64xf32>
    %cst_18 = arith.constant 0.000000e+00 : f32
    %69 = vector.broadcast %cst_18 : f32 to vector<8x64xf32>
    %70 = arith.maximumf %68, %69 : vector<8x64xf32>
    %c16 = arith.constant 16 : index
    %c0_19 = arith.constant 0 : index
    %71 = vector.load %arg2[%c16, %c0_19] : memref<272x64xf32, #tpu.memory_space<vmem>>, vector<64x64xf32>
    %c3 = arith.constant 3 : index
    %c0_20 = arith.constant 0 : index
    %72 = vector.load %arg3[%c3, %c0_20] : memref<13x64xf32, #tpu.memory_space<vmem>>, vector<1x64xf32>
    %c4 = arith.constant 4 : index
    %c0_21 = arith.constant 0 : index
    %73 = vector.load %arg3[%c4, %c0_21] : memref<13x64xf32, #tpu.memory_space<vmem>>, vector<1x64xf32>
    %c5 = arith.constant 5 : index
    %c0_22 = arith.constant 0 : index
    %74 = vector.load %arg3[%c5, %c0_22] : memref<13x64xf32, #tpu.memory_space<vmem>>, vector<1x64xf32>
    %cst_23 = arith.constant dense<0.000000e+00> : vector<8x64xf32>
    %75 = tpu.matmul %70, %71, %cst_23 {dimension_numbers = #tpu.dot_dimension_numbers<[1], [0], [0], [1], [0, 0, 1, 1], [], []>} : vector<8x64xf32>, vector<64x64xf32>, vector<8x64xf32> -> vector<8x64xf32>
    %76 = vector.broadcast %72 : vector<1x64xf32> to vector<8x64xf32>
    %77 = arith.addf %75, %76 : vector<8x64xf32>
    %cst_24 = arith.constant dense<0.000000e+00> : vector<8xf32>
    %78 = vector.multi_reduction <add>, %77, %cst_24 [1] : vector<8x64xf32> to vector<8xf32>
    %79 = vector.shape_cast %78 : vector<8xf32> to vector<8x1xf32>
    %cst_25 = arith.constant 0.000000e+00 : f32
    %80 = vector.shape_cast %2 : vector<1x64xi1> to vector<1x64xi1>
    %81 = vector.broadcast %80 : vector<1x64xi1> to vector<8x64xi1>
    %82 = vector.broadcast %cst_25 : f32 to vector<8x64xf32>
    %83 = arith.select %81, %77, %82 : vector<8x64xi1>, vector<8x64xf32>
    %cst_26 = arith.constant dense<0.000000e+00> : vector<8xf32>
    %84 = vector.multi_reduction <add>, %83, %cst_26 [1] : vector<8x64xf32> to vector<8xf32>
    %85 = vector.shape_cast %84 : vector<8xf32> to vector<8x1xf32>
    %86 = arith.subf %79, %85 : vector<8x1xf32>
    %87 = vector.shape_cast %2 : vector<1x64xi1> to vector<1x64xi1>
    %88 = vector.broadcast %87 : vector<1x64xi1> to vector<8x64xi1>
    %89 = vector.shape_cast %85 : vector<8x1xf32> to vector<8x1xf32>
    %90 = vector.broadcast %89 : vector<8x1xf32> to vector<8x64xf32>
    %91 = vector.shape_cast %86 : vector<8x1xf32> to vector<8x1xf32>
    %92 = vector.broadcast %91 : vector<8x1xf32> to vector<8x64xf32>
    %93 = arith.select %88, %90, %92 : vector<8x64xi1>, vector<8x64xf32>
    %cst_27 = arith.constant 3.125000e-02 : f32
    %94 = vector.broadcast %cst_27 : f32 to vector<8x64xf32>
    %95 = arith.mulf %93, %94 : vector<8x64xf32>
    %96 = arith.subf %77, %95 : vector<8x64xf32>
    %97 = arith.mulf %96, %96 : vector<8x64xf32>
    %cst_28 = arith.constant dense<0.000000e+00> : vector<8xf32>
    %98 = vector.multi_reduction <add>, %97, %cst_28 [1] : vector<8x64xf32> to vector<8xf32>
    %99 = vector.shape_cast %98 : vector<8xf32> to vector<8x1xf32>
    %cst_29 = arith.constant 0.000000e+00 : f32
    %100 = vector.shape_cast %2 : vector<1x64xi1> to vector<1x64xi1>
    %101 = vector.broadcast %100 : vector<1x64xi1> to vector<8x64xi1>
    %102 = vector.broadcast %cst_29 : f32 to vector<8x64xf32>
    %103 = arith.select %101, %97, %102 : vector<8x64xi1>, vector<8x64xf32>
    %cst_30 = arith.constant dense<0.000000e+00> : vector<8xf32>
    %104 = vector.multi_reduction <add>, %103, %cst_30 [1] : vector<8x64xf32> to vector<8xf32>
    %105 = vector.shape_cast %104 : vector<8xf32> to vector<8x1xf32>
    %106 = arith.subf %99, %105 : vector<8x1xf32>
    %107 = vector.shape_cast %2 : vector<1x64xi1> to vector<1x64xi1>
    %108 = vector.broadcast %107 : vector<1x64xi1> to vector<8x64xi1>
    %109 = vector.shape_cast %105 : vector<8x1xf32> to vector<8x1xf32>
    %110 = vector.broadcast %109 : vector<8x1xf32> to vector<8x64xf32>
    %111 = vector.shape_cast %106 : vector<8x1xf32> to vector<8x1xf32>
    %112 = vector.broadcast %111 : vector<8x1xf32> to vector<8x64xf32>
    %113 = arith.select %108, %110, %112 : vector<8x64xi1>, vector<8x64xf32>
    %cst_31 = arith.constant 3.125000e-02 : f32
    %114 = vector.broadcast %cst_31 : f32 to vector<8x64xf32>
    %115 = arith.mulf %113, %114 : vector<8x64xf32>
    %cst_32 = arith.constant 9.99999974E-6 : f32
    %116 = vector.broadcast %cst_32 : f32 to vector<8x64xf32>
    %117 = arith.addf %115, %116 : vector<8x64xf32>
    %118 = math.rsqrt %117 : vector<8x64xf32>
    %119 = arith.mulf %96, %118 : vector<8x64xf32>
    %120 = vector.broadcast %73 : vector<1x64xf32> to vector<8x64xf32>
    %121 = arith.mulf %119, %120 : vector<8x64xf32>
    %122 = vector.broadcast %74 : vector<1x64xf32> to vector<8x64xf32>
    %123 = arith.addf %121, %122 : vector<8x64xf32>
    %cst_33 = arith.constant 0.000000e+00 : f32
    %124 = vector.broadcast %cst_33 : f32 to vector<8x64xf32>
    %125 = arith.maximumf %123, %124 : vector<8x64xf32>
    %c80 = arith.constant 80 : index
    %c0_34 = arith.constant 0 : index
    %126 = vector.load %arg2[%c80, %c0_34] : memref<272x64xf32, #tpu.memory_space<vmem>>, vector<64x64xf32>
    %c6 = arith.constant 6 : index
    %c0_35 = arith.constant 0 : index
    %127 = vector.load %arg3[%c6, %c0_35] : memref<13x64xf32, #tpu.memory_space<vmem>>, vector<1x64xf32>
    %c7 = arith.constant 7 : index
    %c0_36 = arith.constant 0 : index
    %128 = vector.load %arg3[%c7, %c0_36] : memref<13x64xf32, #tpu.memory_space<vmem>>, vector<1x64xf32>
    %c8 = arith.constant 8 : index
    %c0_37 = arith.constant 0 : index
    %129 = vector.load %arg3[%c8, %c0_37] : memref<13x64xf32, #tpu.memory_space<vmem>>, vector<1x64xf32>
    %cst_38 = arith.constant dense<0.000000e+00> : vector<8x64xf32>
    %130 = tpu.matmul %125, %126, %cst_38 {dimension_numbers = #tpu.dot_dimension_numbers<[1], [0], [0], [1], [0, 0, 1, 1], [], []>} : vector<8x64xf32>, vector<64x64xf32>, vector<8x64xf32> -> vector<8x64xf32>
    %131 = vector.broadcast %127 : vector<1x64xf32> to vector<8x64xf32>
    %132 = arith.addf %130, %131 : vector<8x64xf32>
    %cst_39 = arith.constant dense<0.000000e+00> : vector<8xf32>
    %133 = vector.multi_reduction <add>, %132, %cst_39 [1] : vector<8x64xf32> to vector<8xf32>
    %134 = vector.shape_cast %133 : vector<8xf32> to vector<8x1xf32>
    %cst_40 = arith.constant 0.000000e+00 : f32
    %135 = vector.shape_cast %2 : vector<1x64xi1> to vector<1x64xi1>
    %136 = vector.broadcast %135 : vector<1x64xi1> to vector<8x64xi1>
    %137 = vector.broadcast %cst_40 : f32 to vector<8x64xf32>
    %138 = arith.select %136, %132, %137 : vector<8x64xi1>, vector<8x64xf32>
    %cst_41 = arith.constant dense<0.000000e+00> : vector<8xf32>
    %139 = vector.multi_reduction <add>, %138, %cst_41 [1] : vector<8x64xf32> to vector<8xf32>
    %140 = vector.shape_cast %139 : vector<8xf32> to vector<8x1xf32>
    %141 = arith.subf %134, %140 : vector<8x1xf32>
    %142 = vector.shape_cast %2 : vector<1x64xi1> to vector<1x64xi1>
    %143 = vector.broadcast %142 : vector<1x64xi1> to vector<8x64xi1>
    %144 = vector.shape_cast %140 : vector<8x1xf32> to vector<8x1xf32>
    %145 = vector.broadcast %144 : vector<8x1xf32> to vector<8x64xf32>
    %146 = vector.shape_cast %141 : vector<8x1xf32> to vector<8x1xf32>
    %147 = vector.broadcast %146 : vector<8x1xf32> to vector<8x64xf32>
    %148 = arith.select %143, %145, %147 : vector<8x64xi1>, vector<8x64xf32>
    %cst_42 = arith.constant 3.125000e-02 : f32
    %149 = vector.broadcast %cst_42 : f32 to vector<8x64xf32>
    %150 = arith.mulf %148, %149 : vector<8x64xf32>
    %151 = arith.subf %132, %150 : vector<8x64xf32>
    %152 = arith.mulf %151, %151 : vector<8x64xf32>
    %cst_43 = arith.constant dense<0.000000e+00> : vector<8xf32>
    %153 = vector.multi_reduction <add>, %152, %cst_43 [1] : vector<8x64xf32> to vector<8xf32>
    %154 = vector.shape_cast %153 : vector<8xf32> to vector<8x1xf32>
    %cst_44 = arith.constant 0.000000e+00 : f32
    %155 = vector.shape_cast %2 : vector<1x64xi1> to vector<1x64xi1>
    %156 = vector.broadcast %155 : vector<1x64xi1> to vector<8x64xi1>
    %157 = vector.broadcast %cst_44 : f32 to vector<8x64xf32>
    %158 = arith.select %156, %152, %157 : vector<8x64xi1>, vector<8x64xf32>
    %cst_45 = arith.constant dense<0.000000e+00> : vector<8xf32>
    %159 = vector.multi_reduction <add>, %158, %cst_45 [1] : vector<8x64xf32> to vector<8xf32>
    %160 = vector.shape_cast %159 : vector<8xf32> to vector<8x1xf32>
    %161 = arith.subf %154, %160 : vector<8x1xf32>
    %162 = vector.shape_cast %2 : vector<1x64xi1> to vector<1x64xi1>
    %163 = vector.broadcast %162 : vector<1x64xi1> to vector<8x64xi1>
    %164 = vector.shape_cast %160 : vector<8x1xf32> to vector<8x1xf32>
    %165 = vector.broadcast %164 : vector<8x1xf32> to vector<8x64xf32>
    %166 = vector.shape_cast %161 : vector<8x1xf32> to vector<8x1xf32>
    %167 = vector.broadcast %166 : vector<8x1xf32> to vector<8x64xf32>
    %168 = arith.select %163, %165, %167 : vector<8x64xi1>, vector<8x64xf32>
    %cst_46 = arith.constant 3.125000e-02 : f32
    %169 = vector.broadcast %cst_46 : f32 to vector<8x64xf32>
    %170 = arith.mulf %168, %169 : vector<8x64xf32>
    %cst_47 = arith.constant 9.99999974E-6 : f32
    %171 = vector.broadcast %cst_47 : f32 to vector<8x64xf32>
    %172 = arith.addf %170, %171 : vector<8x64xf32>
    %173 = math.rsqrt %172 : vector<8x64xf32>
    %174 = arith.mulf %151, %173 : vector<8x64xf32>
    %175 = vector.broadcast %128 : vector<1x64xf32> to vector<8x64xf32>
    %176 = arith.mulf %174, %175 : vector<8x64xf32>
    %177 = vector.broadcast %129 : vector<1x64xf32> to vector<8x64xf32>
    %178 = arith.addf %176, %177 : vector<8x64xf32>
    %cst_48 = arith.constant 0.000000e+00 : f32
    %179 = vector.broadcast %cst_48 : f32 to vector<8x64xf32>
    %180 = arith.maximumf %178, %179 : vector<8x64xf32>
    %c144 = arith.constant 144 : index
    %c0_49 = arith.constant 0 : index
    %181 = vector.load %arg2[%c144, %c0_49] : memref<272x64xf32, #tpu.memory_space<vmem>>, vector<64x64xf32>
    %c9 = arith.constant 9 : index
    %c0_50 = arith.constant 0 : index
    %182 = vector.load %arg3[%c9, %c0_50] : memref<13x64xf32, #tpu.memory_space<vmem>>, vector<1x64xf32>
    %c10 = arith.constant 10 : index
    %c0_51 = arith.constant 0 : index
    %183 = vector.load %arg3[%c10, %c0_51] : memref<13x64xf32, #tpu.memory_space<vmem>>, vector<1x64xf32>
    %c11 = arith.constant 11 : index
    %c0_52 = arith.constant 0 : index
    %184 = vector.load %arg3[%c11, %c0_52] : memref<13x64xf32, #tpu.memory_space<vmem>>, vector<1x64xf32>
    %cst_53 = arith.constant dense<0.000000e+00> : vector<8x64xf32>
    %185 = tpu.matmul %180, %181, %cst_53 {dimension_numbers = #tpu.dot_dimension_numbers<[1], [0], [0], [1], [0, 0, 1, 1], [], []>} : vector<8x64xf32>, vector<64x64xf32>, vector<8x64xf32> -> vector<8x64xf32>
    %186 = vector.broadcast %182 : vector<1x64xf32> to vector<8x64xf32>
    %187 = arith.addf %185, %186 : vector<8x64xf32>
    %cst_54 = arith.constant dense<0.000000e+00> : vector<8xf32>
    %188 = vector.multi_reduction <add>, %187, %cst_54 [1] : vector<8x64xf32> to vector<8xf32>
    %189 = vector.shape_cast %188 : vector<8xf32> to vector<8x1xf32>
    %cst_55 = arith.constant 0.000000e+00 : f32
    %190 = vector.shape_cast %2 : vector<1x64xi1> to vector<1x64xi1>
    %191 = vector.broadcast %190 : vector<1x64xi1> to vector<8x64xi1>
    %192 = vector.broadcast %cst_55 : f32 to vector<8x64xf32>
    %193 = arith.select %191, %187, %192 : vector<8x64xi1>, vector<8x64xf32>
    %cst_56 = arith.constant dense<0.000000e+00> : vector<8xf32>
    %194 = vector.multi_reduction <add>, %193, %cst_56 [1] : vector<8x64xf32> to vector<8xf32>
    %195 = vector.shape_cast %194 : vector<8xf32> to vector<8x1xf32>
    %196 = arith.subf %189, %195 : vector<8x1xf32>
    %197 = vector.shape_cast %2 : vector<1x64xi1> to vector<1x64xi1>
    %198 = vector.broadcast %197 : vector<1x64xi1> to vector<8x64xi1>
    %199 = vector.shape_cast %195 : vector<8x1xf32> to vector<8x1xf32>
    %200 = vector.broadcast %199 : vector<8x1xf32> to vector<8x64xf32>
    %201 = vector.shape_cast %196 : vector<8x1xf32> to vector<8x1xf32>
    %202 = vector.broadcast %201 : vector<8x1xf32> to vector<8x64xf32>
    %203 = arith.select %198, %200, %202 : vector<8x64xi1>, vector<8x64xf32>
    %cst_57 = arith.constant 3.125000e-02 : f32
    %204 = vector.broadcast %cst_57 : f32 to vector<8x64xf32>
    %205 = arith.mulf %203, %204 : vector<8x64xf32>
    %206 = arith.subf %187, %205 : vector<8x64xf32>
    %207 = arith.mulf %206, %206 : vector<8x64xf32>
    %cst_58 = arith.constant dense<0.000000e+00> : vector<8xf32>
    %208 = vector.multi_reduction <add>, %207, %cst_58 [1] : vector<8x64xf32> to vector<8xf32>
    %209 = vector.shape_cast %208 : vector<8xf32> to vector<8x1xf32>
    %cst_59 = arith.constant 0.000000e+00 : f32
    %210 = vector.shape_cast %2 : vector<1x64xi1> to vector<1x64xi1>
    %211 = vector.broadcast %210 : vector<1x64xi1> to vector<8x64xi1>
    %212 = vector.broadcast %cst_59 : f32 to vector<8x64xf32>
    %213 = arith.select %211, %207, %212 : vector<8x64xi1>, vector<8x64xf32>
    %cst_60 = arith.constant dense<0.000000e+00> : vector<8xf32>
    %214 = vector.multi_reduction <add>, %213, %cst_60 [1] : vector<8x64xf32> to vector<8xf32>
    %215 = vector.shape_cast %214 : vector<8xf32> to vector<8x1xf32>
    %216 = arith.subf %209, %215 : vector<8x1xf32>
    %217 = vector.shape_cast %2 : vector<1x64xi1> to vector<1x64xi1>
    %218 = vector.broadcast %217 : vector<1x64xi1> to vector<8x64xi1>
    %219 = vector.shape_cast %215 : vector<8x1xf32> to vector<8x1xf32>
    %220 = vector.broadcast %219 : vector<8x1xf32> to vector<8x64xf32>
    %221 = vector.shape_cast %216 : vector<8x1xf32> to vector<8x1xf32>
    %222 = vector.broadcast %221 : vector<8x1xf32> to vector<8x64xf32>
    %223 = arith.select %218, %220, %222 : vector<8x64xi1>, vector<8x64xf32>
    %cst_61 = arith.constant 3.125000e-02 : f32
    %224 = vector.broadcast %cst_61 : f32 to vector<8x64xf32>
    %225 = arith.mulf %223, %224 : vector<8x64xf32>
    %cst_62 = arith.constant 9.99999974E-6 : f32
    %226 = vector.broadcast %cst_62 : f32 to vector<8x64xf32>
    %227 = arith.addf %225, %226 : vector<8x64xf32>
    %228 = math.rsqrt %227 : vector<8x64xf32>
    %229 = arith.mulf %206, %228 : vector<8x64xf32>
    %230 = vector.broadcast %183 : vector<1x64xf32> to vector<8x64xf32>
    %231 = arith.mulf %229, %230 : vector<8x64xf32>
    %232 = vector.broadcast %184 : vector<1x64xf32> to vector<8x64xf32>
    %233 = arith.addf %231, %232 : vector<8x64xf32>
    %cst_63 = arith.constant 0.000000e+00 : f32
    %234 = vector.broadcast %cst_63 : f32 to vector<8x64xf32>
    %235 = arith.maximumf %233, %234 : vector<8x64xf32>
    %c208 = arith.constant 208 : index
    %c0_64 = arith.constant 0 : index
    %236 = vector.load %arg2[%c208, %c0_64] : memref<272x64xf32, #tpu.memory_space<vmem>>, vector<64x64xf32>
    %c12 = arith.constant 12 : index
    %c0_65 = arith.constant 0 : index
    %237 = vector.load %arg3[%c12, %c0_65] : memref<13x64xf32, #tpu.memory_space<vmem>>, vector<1x64xf32>
    %cst_66 = arith.constant dense<0.000000e+00> : vector<8x64xf32>
    %238 = tpu.matmul %235, %236, %cst_66 {dimension_numbers = #tpu.dot_dimension_numbers<[1], [0], [0], [1], [0, 0, 1, 1], [], []>} : vector<8x64xf32>, vector<64x64xf32>, vector<8x64xf32> -> vector<8x64xf32>
    %239 = vector.broadcast %237 : vector<1x64xf32> to vector<8x64xf32>
    %240 = arith.addf %238, %239 : vector<8x64xf32>
    %c0_67 = arith.constant 0 : index
    %c0_68 = arith.constant 0 : index
    %241 = vector.load %arg4[%c0_67, %c0_68] : memref<8x64xf32, #tpu.memory_space<vmem>>, vector<8x64xf32>
    tpu.vector_store %arg4[%c0_67, %c0_68], %240 {strides = array<i32>} : memref<8x64xf32, #tpu.memory_space<vmem>>, vector<8x64xf32>,
    return
  }
  func.func @transform_0(%arg0: i32) -> (i32, i32) {
    %c0_i32 = arith.constant 0 : i32
    %c0_i32_0 = arith.constant 0 : i32
    return %arg0, %c0_i32 : i32, i32
  }
  func.func @transform_1(%arg0: i32) -> (i32, i32) {
    %c0_i32 = arith.constant 0 : i32
    %c0_i32_0 = arith.constant 0 : i32
    %c0_i32_1 = arith.constant 0 : i32
    return %c0_i32, %c0_i32_0 : i32, i32
  }
  func.func @transform_2(%arg0: i32) -> (i32, i32) {
    %c0_i32 = arith.constant 0 : i32
    %c0_i32_0 = arith.constant 0 : i32
    %c0_i32_1 = arith.constant 0 : i32
    return %c0_i32, %c0_i32_0 : i32, i32
  }
  func.func @transform_3(%arg0: i32) -> (i32, i32) {
    %c0_i32 = arith.constant 0 : i32
    %c0_i32_0 = arith.constant 0 : i32
    return %arg0, %c0_i32 : i32, i32
  }
}

</mosaic_0001>

<bundles_post_ra>
// kernel: rl_agent_forward.1
= control target key start
LH: loop header
LB: loop body
LE: loop exit
PB: predicated region body
PF: predicated region fallthrough
CT: control target
= control target key end

     0   :  { %v761_v0 = vmov 0.0   ;;  %vm762_vm0 = vmmov 0   ;;  %vm32_vm1 = vcmask 130048   ;;  %v14_v4 = vlaneseq  ;;  %s1033_s1 = inlined_call_operand.vmem [shape: f32[272,64], index: 1, kind: input, shape index: {}]   ;;  %s1034_s0 = inlined_call_operand.vmem [shape: f32[8,16], index: 0, kind: input, shape index: {}]   ;;  %s1035_s2 = inlined_call_operand.vmem [shape: f32[13,64], index: 2, kind: input, shape index: {}]   ;;  %s1036_s3 = inlined_call_operand.vmem [shape: f32[8,64], index: 3, kind: output, shape index: {}]  }
   0x1   :  { %668 = vmatprep.subr.mxu0 %v761_v0  ;;  %v24_v1 = vld [vmem:[%s1033_s1 + $0x8] sm:$0xff]  ;;  %v23_v2 = vld [vmem:[%s1033_s1] sm:$0xff]  ;;  %672 = vmatprep.mubr.msk.f32.mxu0 %vm762_vm0, %v761_v0  ;;  %vm106_vm2 = vcmask 523264   ;;  %v153_v26 = vld [vmem:[%s1033_s1 + $0x38] sm:$0xff] }
   0x2   :  { %669 = vmatpush3.msra.mxu0 %v24_v1  ;;  %v22_v3 = vld [vmem:[%s1034_s0] sm:$0xff]  ;;  %675 = vmatprep.subr.mxu1 %v761_v0  ;;  %v802_v5 = vand.u32 127, %v14_v4  ;;  %v155_v24 = vld [vmem:[%s1033_s1 + $0x48] sm:$0xff]  ;;  %v152_v27 = vld [vmem:[%s1033_s1 + $0x30] sm:$0xff] }
   0x3   :  { %670 = vmatprep.subr.mxu0 %v761_v0  ;;  %691 = vmatprep.mubr.msk.f32.mxu1 %vm762_vm0, %v761_v0  ;;  %v611_v6 = vld [vmem:[%s1035_s2] ss:$0 sm:$0xff]  ;;  %v151_v28 = vld [vmem:[%s1033_s1 + $0x28] sm:$0xff]  ;;  %v149_v30 = vld [vmem:[%s1033_s1 + $0x18] sm:$0xff] }
   0x4   :  { %671 = vmatpush3.msra.mxu0 %v23_v2  ;;  %vm16_vm3 = vcmp.lt.s32.totalorder %v802_v5, 32  ;;  %vm18_vm4 = vcmp.ge.s32.totalorder %v802_v5, 32  ;;  %vm19_vm5 = vcmp.lt.s32.totalorder %v802_v5, 48  ;;  %vm17_vm6 = vcmp.lt.s32.totalorder %v802_v5, 16  ;;  %v154_v25 = vld [vmem:[%s1033_s1 + $0x40] sm:$0xff]  ;;  %676 = vmatpush3.msra.mxu1 %v155_v24  ;;  %v148_v31 = vld [vmem:[%s1033_s1 + $0x10] sm:$0xff] }
   0x5   :  { %673 = vmatmul.mubr.msk.f32.vlgmr.msra.gmra.mxu0 %vm32_vm1, %v22_v3  ;;  %694 = vmatprep.subr.mxu0 %v761_v0  ;;  %vm20_vm7 = vmand %vm18_vm4, %vm19_vm5  ;;  %v150_v29 = vld [vmem:[%s1033_s1 + $0x20] sm:$0xff]  ;;  %v279_v62 = vld [vmem:[%s1033_s1 + $0x88] sm:$0xff] }
   0x6   :  { %710 = vmatprep.mubr.msk.f32.mxu0 %vm762_vm0, %v761_v0  ;;  %vm21_vm8 = vmor %vm17_vm6, %vm20_vm7  ;;  %677 = vmatprep.subr.mxu1 %v761_v0  ;;  %v613_v39 = vld [vmem:[%s1035_s2 + $0x1] ss:$0 sm:$0xff]  ;;  %v614_v41 = vld [vmem:[%s1035_s2 + $0x2] ss:$0 sm:$0xff] }
   0x7   :  { %678 = vmatpush3.msra.mxu1 %v154_v25  ;;  %v615_v45 = vld [vmem:[%s1035_s2 + $0x3] ss:$0 sm:$0xff]  ;;  %695 = vmatpush3.msra.mxu0 %v279_v62  ;;  %v277_v1 = vld [vmem:[%s1033_s1 + $0x78] sm:$0xff]  ;;  %v276_v2 = vld [vmem:[%s1033_s1 + $0x70] sm:$0xff] }
   0x8   :  { %679 = vmatprep.subr.mxu1 %v761_v0  ;;  %v278_v63 = vld [vmem:[%s1033_s1 + $0x80] sm:$0xff]  ;;  %696 = vmatprep.subr.mxu0 %v761_v0  ;;  %v275_v3 = vld [vmem:[%s1033_s1 + $0x68] sm:$0xff] }
   0x9   :  { %680 = vmatpush3.msra.mxu1 %v153_v26  ;;  %697 = vmatpush3.msra.mxu0 %v278_v63  ;;  %v274_v4 = vld [vmem:[%s1033_s1 + $0x60] sm:$0xff]  ;;  %v627_v5 = vld [vmem:[%s1035_s2 + $0xc] ss:$0 sm:$0xff] }
   0xa   :  { %681 = vmatprep.subr.mxu1 %v761_v0  ;;  %698 = vmatprep.subr.mxu0 %v761_v0 }
   0xb   :  { %682 = vmatpush3.msra.mxu1 %v152_v27  ;;  %699 = vmatpush3.msra.mxu0 %v277_v1 }
   0xc   :  { %683 = vmatprep.subr.mxu1 %v761_v0  ;;  %700 = vmatprep.subr.mxu0 %v761_v0 }
   0xd   :  { %684 = vmatpush3.msra.mxu1 %v151_v28  ;;  %701 = vmatpush3.msra.mxu0 %v276_v2 }
   0xe   :  { %685 = vmatprep.subr.mxu1 %v761_v0  ;;  %702 = vmatprep.subr.mxu0 %v761_v0 }
   0xf   :  { %686 = vmatpush3.msra.mxu1 %v150_v29  ;;  %703 = vmatpush3.msra.mxu0 %v275_v3 }
  0x10   :  { %687 = vmatprep.subr.mxu1 %v761_v0  ;;  %704 = vmatprep.subr.mxu0 %v761_v0 }
  0x11   :  { %688 = vmatpush3.msra.mxu1 %v149_v30  ;;  %705 = vmatpush3.msra.mxu0 %v274_v4 }
  0x12   :  { %689 = vmatprep.subr.mxu1 %v761_v0  ;;  %706 = vmatprep.subr.mxu0 %v761_v0 }
  0x13   :  { %690 = vmatpush3.msra.mxu1 %v148_v31 }
  0x14   :  { %713 = vmatprep.subr.mxu1 %v761_v0 }
  0xc5   :  { %v102_v7 = vpop.f32.mrf.mxu0 }
  0xc6   :  { %v103_v8 = vadd.f32 %v611_v6, %v102_v7  ;;  %v273_v6 = vld [vmem:[%s1033_s1 + $0x58] sm:$0xff]  ;;  %v272_v7 = vld [vmem:[%s1033_s1 + $0x50] sm:$0xff] }
  0xc7   :  { %v674_v9 = vpop.f32.mrf.mxu0  ;;  %707 = vmatpush3.msra.mxu0 %v273_v6 }
  0xc8   :  { %v107_v10 = vsel %vm106_vm2, %v103_v8, 0.0  ;;  %v112_v11 = vsel %vm16_vm3, %v103_v8, 0.0  ;;  %708 = vmatprep.subr.mxu0 %v761_v0 }
  0xc9   :  { %108 = vadd.xlane.f32.xlu0 %v107_v10  ;;  %v113_v12 = vsel %vm106_vm2, %v112_v11, 0.0  ;;  %709 = vmatpush3.msra.mxu0 %v272_v7 }
  0xca   :  { %732 = vmatprep.subr.mxu0 %v761_v0 }
  0xcd   :  { %114 = vadd.xlane.f32.xlu0 %v113_v12 }
 0x152   :  { %v109_v13 = vpop.xlane.xlu0 %108 }
 0x156   :  { %v115_v14 = vpop.xlane.xlu0 %114 }
 0x157   :  { %v116_v15 = vsub.f32 %v109_v13, %v115_v14 }
 0x159   :  { %v117_v16 = vsel %vm16_vm3, %v115_v14, %v116_v15  ;;  %v617_v15 = vld [vmem:[%s1035_s2 + $0x4] ss:$0 sm:$0xff] }
 0x15a   :  { %v118_v17 = vmul.f32 0.0625, %v117_v16 }
 0x15c   :  { %v119_v18 = vsub.f32 %v103_v8, %v118_v17  ;;  %v618_v17 = vld [vmem:[%s1035_s2 + $0x5] ss:$0 sm:$0xff] }
 0x15e   :  { %v120_v19 = vmul.f32 %v119_v18, %v119_v18 }
 0x160   :  { %v123_v20 = vsel %vm21_vm8, %v120_v19, 0.0 }
 0x161   :  { %v124_v21 = vsel %vm106_vm2, %v123_v20, 0.0  ;;  %v127_v22 = vsel %vm16_vm3, %v123_v20, 0.0 }
 0x162   :  { %125 = vadd.xlane.f32.xlu1 %v124_v21  ;;  %v128_v23 = vsel %vm106_vm2, %v127_v22, 0.0  ;;  %v619_v21 = vld [vmem:[%s1035_s2 + $0x6] ss:$0 sm:$0xff] }
 0x166   :  { %129 = vadd.xlane.f32.xlu1 %v128_v23 }
 0x1eb   :  { %v126_v32 = vpop.xlane.xlu1 %125 }
 0x1ef   :  { %v130_v33 = vpop.xlane.xlu1 %129 }
 0x1f0   :  { %v131_v34 = vsub.f32 %v126_v32, %v130_v33 }
 0x1f2   :  { %v132_v35 = vsel %vm16_vm3, %v130_v33, %v131_v34 }
 0x1f3   :  { %v133_v36 = vmul.f32 0.0625, %v132_v35 }
 0x1f5   :  { %v134_v37 = vadd.f32 1e-05, %v133_v36 }
 0x1f7   :  { %753 = vrsqrt.f32 %v134_v37 }
 0x204   :  { %v754_v38 = vpop.eup %753 }
 0x205   :  { %v136_v40 = vmul.f32 %v754_v38, %v119_v18  ;;  %v403_v38 = vld [vmem:[%s1033_s1 + $0xc8] sm:$0xff] }
 0x207   :  { %v141_v42 = vmul.f32 %v613_v39, %v136_v40  ;;  %v402_v39 = vld [vmem:[%s1033_s1 + $0xc0] sm:$0xff]  ;;  %v401_v40 = vld [vmem:[%s1033_s1 + $0xb8] sm:$0xff] }
 0x209   :  { %v146_v43 = vadd.f32 %v614_v41, %v141_v42  ;;  %v400_v41 = vld [vmem:[%s1033_s1 + $0xb0] sm:$0xff]  ;;  %v399_v42 = vld [vmem:[%s1033_s1 + $0xa8] sm:$0xff] }
 0x20b   :  { %v147_v44 = vmax.f32 %v146_v43, 0.0  ;;  %v398_v43 = vld [vmem:[%s1033_s1 + $0xa0] sm:$0xff] }
 0x20d   :  { %692 = vmatmul.mubr.msk.f32.vlgmr.msra.gmra.mxu1 %vm106_vm2, %v147_v44  ;;  %v397_v44 = vld [vmem:[%s1033_s1 + $0x98] sm:$0xff] }
 0x20e   :  { %729 = vmatprep.mubr.msk.f32.mxu1 %vm762_vm0, %v761_v0  ;;  %714 = vmatpush3.msra.mxu1 %v403_v38 }
 0x20f   :  { %715 = vmatprep.subr.mxu1 %v761_v0 }
 0x210   :  { %716 = vmatpush3.msra.mxu1 %v402_v39 }
 0x211   :  { %717 = vmatprep.subr.mxu1 %v761_v0 }
 0x212   :  { %718 = vmatpush3.msra.mxu1 %v401_v40 }
 0x213   :  { %719 = vmatprep.subr.mxu1 %v761_v0 }
 0x214   :  { %720 = vmatpush3.msra.mxu1 %v400_v41 }
 0x215   :  { %721 = vmatprep.subr.mxu1 %v761_v0 }
 0x216   :  { %722 = vmatpush3.msra.mxu1 %v399_v42 }
 0x217   :  { %723 = vmatprep.subr.mxu1 %v761_v0 }
 0x218   :  { %724 = vmatpush3.msra.mxu1 %v398_v43 }
 0x219   :  { %725 = vmatprep.subr.mxu1 %v761_v0 }
 0x21a   :  { %726 = vmatpush3.msra.mxu1 %v397_v44 }
 0x21b   :  { %727 = vmatprep.subr.mxu1 %v761_v0 }
 0x2cd   :  { %v232_v46 = vpop.f32.mrf.mxu1 }
 0x2ce   :  { %v233_v47 = vadd.f32 %v615_v45, %v232_v46  ;;  %v396_v45 = vld [vmem:[%s1033_s1 + $0x90] sm:$0xff] }
 0x2cf   :  { %v693_v48 = vpop.f32.mrf.mxu1  ;;  %728 = vmatpush3.msra.mxu1 %v396_v45 }
 0x2d0   :  { %v236_v49 = vsel %vm106_vm2, %v233_v47, 0.0  ;;  %v239_v50 = vsel %vm16_vm3, %v233_v47, 0.0 }
 0x2d1   :  { %237 = vadd.xlane.f32.xlu0 %v236_v49  ;;  %v240_v51 = vsel %vm106_vm2, %v239_v50, 0.0 }
 0x2d2   :  { %241 = vadd.xlane.f32.xlu1 %v240_v51 }
 0x35a   :  { %v238_v52 = vpop.xlane.xlu0 %237 }
 0x35b   :  { %v242_v53 = vpop.xlane.xlu1 %241 }
 0x35c   :  { %v243_v54 = vsub.f32 %v238_v52, %v242_v53 }
 0x35e   :  { %v244_v55 = vsel %vm16_vm3, %v242_v53, %v243_v54  ;;  %v621_v53 = vld [vmem:[%s1035_s2 + $0x7] ss:$0 sm:$0xff] }
 0x35f   :  { %v245_v56 = vmul.f32 0.03125, %v244_v55  ;;  %v622_v55 = vld [vmem:[%s1035_s2 + $0x8] ss:$0 sm:$0xff] }
 0x361   :  { %v246_v57 = vsub.f32 %v233_v47, %v245_v56 }
 0x363   :  { %v247_v58 = vmul.f32 %v246_v57, %v246_v57 }
 0x365   :  { %v248_v59 = vsel %vm106_vm2, %v247_v58, 0.0  ;;  %v251_v60 = vsel %vm16_vm3, %v247_v58, 0.0 }
 0x366   :  { %249 = vadd.xlane.f32.xlu0 %v248_v59  ;;  %v252_v61 = vsel %vm106_vm2, %v251_v60, 0.0  ;;  %v623_v59 = vld [vmem:[%s1035_s2 + $0x9] ss:$0 sm:$0xff] }
 0x367   :  { %253 = vadd.xlane.f32.xlu1 %v252_v61 }
 0x3ef   :  { %v250_v8 = vpop.xlane.xlu0 %249 }
 0x3f0   :  { %v254_v9 = vpop.xlane.xlu1 %253 }
 0x3f1   :  { %v255_v10 = vsub.f32 %v250_v8, %v254_v9 }
 0x3f3   :  { %v256_v11 = vsel %vm16_vm3, %v254_v9, %v255_v10 }
 0x3f4   :  { %v257_v12 = vmul.f32 0.03125, %v256_v11 }
 0x3f6   :  { %v258_v13 = vadd.f32 1e-05, %v257_v12 }
 0x3f8   :  { %755 = vrsqrt.f32 %v258_v13 }
 0x405   :  { %v756_v14 = vpop.eup %755 }
 0x406   :  { %v260_v16 = vmul.f32 %v756_v14, %v246_v57  ;;  %v527_v14 = vld [vmem:[%s1033_s1 + $0x108] sm:$0xff] }
 0x408   :  { %v265_v18 = vmul.f32 %v617_v15, %v260_v16  ;;  %v526_v15 = vld [vmem:[%s1033_s1 + $0x100] sm:$0xff]  ;;  %v525_v16 = vld [vmem:[%s1033_s1 + $0xf8] sm:$0xff] }
 0x40a   :  { %v270_v19 = vadd.f32 %v618_v17, %v265_v18  ;;  %v524_v17 = vld [vmem:[%s1033_s1 + $0xf0] sm:$0xff]  ;;  %v523_v18 = vld [vmem:[%s1033_s1 + $0xe8] sm:$0xff] }
 0x40c   :  { %v271_v20 = vmax.f32 %v270_v19, 0.0  ;;  %v522_v19 = vld [vmem:[%s1033_s1 + $0xe0] sm:$0xff] }
 0x40e   :  { %711 = vmatmul.mubr.msk.f32.vlgmr.msra.gmra.mxu0 %vm106_vm2, %v271_v20  ;;  %v521_v20 = vld [vmem:[%s1033_s1 + $0xd8] sm:$0xff] }
 0x40f   :  { %748 = vmatprep.mubr.msk.f32.mxu0 %vm762_vm0, %v761_v0  ;;  %733 = vmatpush3.msra.mxu0 %v527_v14 }
 0x410   :  { %734 = vmatprep.subr.mxu0 %v761_v0 }
 0x411   :  { %735 = vmatpush3.msra.mxu0 %v526_v15 }
 0x412   :  { %736 = vmatprep.subr.mxu0 %v761_v0 }
 0x413   :  { %737 = vmatpush3.msra.mxu0 %v525_v16 }
 0x414   :  { %738 = vmatprep.subr.mxu0 %v761_v0 }
 0x415   :  { %739 = vmatpush3.msra.mxu0 %v524_v17 }
 0x416   :  { %740 = vmatprep.subr.mxu0 %v761_v0 }
 0x417   :  { %741 = vmatpush3.msra.mxu0 %v523_v18 }
 0x418   :  { %742 = vmatprep.subr.mxu0 %v761_v0 }
 0x419   :  { %743 = vmatpush3.msra.mxu0 %v522_v19 }
 0x41a   :  { %744 = vmatprep.subr.mxu0 %v761_v0 }
 0x41b   :  { %745 = vmatpush3.msra.mxu0 %v521_v20 }
 0x41c   :  { %746 = vmatprep.subr.mxu0 %v761_v0  ;;  %v626_v0 = vld [vmem:[%s1035_s2 + $0xb] ss:$0 sm:$0xff] }
 0x4ce   :  { %v356_v22 = vpop.f32.mrf.mxu0 }
 0x4cf   :  { %v357_v23 = vadd.f32 %v619_v21, %v356_v22  ;;  %v520_v21 = vld [vmem:[%s1033_s1 + $0xd0] sm:$0xff] }
 0x4d0   :  { %v712_v24 = vpop.f32.mrf.mxu0  ;;  %747 = vmatpush3.msra.mxu0 %v520_v21 }
 0x4d1   :  { %v360_v25 = vsel %vm106_vm2, %v357_v23, 0.0  ;;  %v363_v26 = vsel %vm16_vm3, %v357_v23, 0.0 }
 0x4d2   :  { %361 = vadd.xlane.f32.xlu0 %v360_v25  ;;  %v364_v27 = vsel %vm106_vm2, %v363_v26, 0.0 }
 0x4d3   :  { %365 = vadd.xlane.f32.xlu1 %v364_v27 }
 0x55b   :  { %v362_v28 = vpop.xlane.xlu0 %361 }
 0x55c   :  { %v366_v29 = vpop.xlane.xlu1 %365 }
 0x55d   :  { %v367_v30 = vsub.f32 %v362_v28, %v366_v29 }
 0x55f   :  { %v368_v31 = vsel %vm16_vm3, %v366_v29, %v367_v30  ;;  %v625_v29 = vld [vmem:[%s1035_s2 + $0xa] ss:$0 sm:$0xff] }
 0x560   :  { %v369_v32 = vmul.f32 0.03125, %v368_v31 }
 0x562   :  { %v370_v33 = vsub.f32 %v357_v23, %v369_v32 }
 0x564   :  { %v371_v34 = vmul.f32 %v370_v33, %v370_v33 }
 0x566   :  { %v372_v35 = vsel %vm106_vm2, %v371_v34, 0.0  ;;  %v375_v36 = vsel %vm16_vm3, %v371_v34, 0.0 }
 0x567   :  { %373 = vadd.xlane.f32.xlu0 %v372_v35  ;;  %v376_v37 = vsel %vm106_vm2, %v375_v36, 0.0 }
 0x568   :  { %377 = vadd.xlane.f32.xlu1 %v376_v37 }
 0x5f0   :  { %v374_v46 = vpop.xlane.xlu0 %373 }
 0x5f1   :  { %v378_v47 = vpop.xlane.xlu1 %377 }
 0x5f2   :  { %v379_v48 = vsub.f32 %v374_v46, %v378_v47 }
 0x5f4   :  { %v380_v49 = vsel %vm16_vm3, %v378_v47, %v379_v48 }
 0x5f5   :  { %v381_v50 = vmul.f32 0.03125, %v380_v49 }
 0x5f7   :  { %v382_v51 = vadd.f32 1e-05, %v381_v50 }
 0x5f9   :  { %757 = vrsqrt.f32 %v382_v51 }
 0x606   :  { %v758_v52 = vpop.eup %757 }
 0x607   :  { %v384_v54 = vmul.f32 %v758_v52, %v370_v33 }
 0x609   :  { %v389_v56 = vmul.f32 %v621_v53, %v384_v54 }
 0x60b   :  { %v394_v57 = vadd.f32 %v622_v55, %v389_v56 }
 0x60d   :  { %v395_v58 = vmax.f32 %v394_v57, 0.0 }
 0x60f   :  { %730 = vmatmul.mubr.msk.f32.vlgmr.msra.gmra.mxu1 %vm106_vm2, %v395_v58 }
 0x6cf   :  { %v480_v60 = vpop.f32.mrf.mxu1 }
 0x6d0   :  { %v481_v61 = vadd.f32 %v623_v59, %v480_v60 }
 0x6d1   :  { %v731_v62 = vpop.f32.mrf.mxu1 }
 0x6d2   :  { %v484_v63 = vsel %vm106_vm2, %v481_v61, 0.0  ;;  %v487_v1 = vsel %vm16_vm3, %v481_v61, 0.0 }
 0x6d3   :  { %485 = vadd.xlane.f32.xlu0 %v484_v63  ;;  %v488_v2 = vsel %vm106_vm2, %v487_v1, 0.0 }
 0x6d4   :  { %489 = vadd.xlane.f32.xlu1 %v488_v2 }
 0x75c   :  { %v486_v3 = vpop.xlane.xlu0 %485 }
 0x75d   :  { %v490_v4 = vpop.xlane.xlu1 %489 }
 0x75e   :  { %v491_v6 = vsub.f32 %v486_v3, %v490_v4 }
 0x760   :  { %v492_v7 = vsel %vm16_vm3, %v490_v4, %v491_v6 }
 0x761   :  { %v493_v8 = vmul.f32 0.03125, %v492_v7 }
 0x763   :  { %v494_v9 = vsub.f32 %v481_v61, %v493_v8 }
 0x765   :  { %v495_v10 = vmul.f32 %v494_v9, %v494_v9 }
 0x767   :  { %v496_v11 = vsel %vm106_vm2, %v495_v10, 0.0  ;;  %v499_v12 = vsel %vm16_vm3, %v495_v10, 0.0 }
 0x768   :  { %497 = vadd.xlane.f32.xlu0 %v496_v11  ;;  %v500_v13 = vsel %vm106_vm2, %v499_v12, 0.0 }
 0x769   :  { %501 = vadd.xlane.f32.xlu1 %v500_v13 }
 0x7f1   :  { %v498_v22 = vpop.xlane.xlu0 %497 }
 0x7f2   :  { %v502_v23 = vpop.xlane.xlu1 %501 }
 0x7f3   :  { %v503_v24 = vsub.f32 %v498_v22, %v502_v23 }
 0x7f5   :  { %v504_v25 = vsel %vm16_vm3, %v502_v23, %v503_v24 }
 0x7f6   :  { %v505_v26 = vmul.f32 0.03125, %v504_v25 }
 0x7f8   :  { %v506_v27 = vadd.f32 1e-05, %v505_v26 }
 0x7fa   :  { %759 = vrsqrt.f32 %v506_v27 }
 0x807   :  { %v760_v28 = vpop.eup %759 }
 0x808   :  { %v508_v30 = vmul.f32 %v760_v28, %v494_v9 }
 0x80a   :  { %v513_v31 = vmul.f32 %v625_v29, %v508_v30 }
 0x80c   :  { %v518_v32 = vadd.f32 %v626_v0, %v513_v31 }
 0x80e   :  { %v519_v33 = vmax.f32 %v518_v32, 0.0 }
 0x810   :  { %749 = vmatmul.mubr.msk.f32.vlgmr.msra.gmra.mxu0 %vm106_vm2, %v519_v33 }
 0x8d0   :  { %v602_v34 = vpop.f32.mrf.mxu0 }
 0x8d1   :  { %v603_v35 = vadd.f32 %v627_v5, %v602_v34 }
 0x8d2   :  { %v750_v36 = vpop.f32.mrf.mxu0 }
 0x8d3   :  { %606 = vst.msk [vmem:[%s1036_s3] sm:$0xff] %vm106_vm2, %v603_v35 }

// kernel: rl_agent_forward.1
= control target key start
LH: loop header
LB: loop body
LE: loop exit
PB: predicated region body
PF: predicated region fallthrough
CT: control target
= control target key end

     0   :  { %v761_v0 = vmov 0.0   ;;  %vm762_vm0 = vmmov 0   ;;  %vm32_vm1 = vcmask 130048   ;;  %v14_v4 = vlaneseq  ;;  %s1033_s1 = inlined_call_operand.vmem [shape: f32[272,64], index: 1, kind: input, shape index: {}]   ;;  %s1034_s0 = inlined_call_operand.vmem [shape: f32[8,16], index: 0, kind: input, shape index: {}]   ;;  %s1035_s2 = inlined_call_operand.vmem [shape: f32[13,64], index: 2, kind: input, shape index: {}]   ;;  %s1036_s3 = inlined_call_operand.vmem [shape: f32[8,64], index: 3, kind: output, shape index: {}]  }
   0x1   :  { %668 = vmatprep.subr.mxu0 %v761_v0  ;;  %v24_v1 = vld [vmem:[%s1033_s1 + $0x8] sm:$0xff]  ;;  %v23_v2 = vld [vmem:[%s1033_s1] sm:$0xff]  ;;  %672 = vmatprep.mubr.msk.f32.mxu0 %vm762_vm0, %v761_v0  ;;  %vm106_vm2 = vcmask 523264   ;;  %v153_v26 = vld [vmem:[%s1033_s1 + $0x38] sm:$0xff] }
   0x2   :  { %669 = vmatpush3.msra.mxu0 %v24_v1  ;;  %v22_v3 = vld [vmem:[%s1034_s0] sm:$0xff]  ;;  %675 = vmatprep.subr.mxu1 %v761_v0  ;;  %v802_v5 = vand.u32 127, %v14_v4  ;;  %v155_v24 = vld [vmem:[%s1033_s1 + $0x48] sm:$0xff]  ;;  %v152_v27 = vld [vmem:[%s1033_s1 + $0x30] sm:$0xff] }
   0x3   :  { %670 = vmatprep.subr.mxu0 %v761_v0  ;;  %691 = vmatprep.mubr.msk.f32.mxu1 %vm762_vm0, %v761_v0  ;;  %v611_v6 = vld [vmem:[%s1035_s2] ss:$0 sm:$0xff]  ;;  %v151_v28 = vld [vmem:[%s1033_s1 + $0x28] sm:$0xff]  ;;  %v149_v30 = vld [vmem:[%s1033_s1 + $0x18] sm:$0xff] }
   0x4   :  { %671 = vmatpush3.msra.mxu0 %v23_v2  ;;  %vm16_vm3 = vcmp.lt.s32.totalorder %v802_v5, 32  ;;  %vm18_vm4 = vcmp.ge.s32.totalorder %v802_v5, 32  ;;  %vm19_vm5 = vcmp.lt.s32.totalorder %v802_v5, 48  ;;  %vm17_vm6 = vcmp.lt.s32.totalorder %v802_v5, 16  ;;  %v154_v25 = vld [vmem:[%s1033_s1 + $0x40] sm:$0xff]  ;;  %676 = vmatpush3.msra.mxu1 %v155_v24  ;;  %v148_v31 = vld [vmem:[%s1033_s1 + $0x10] sm:$0xff] }
   0x5   :  { %673 = vmatmul.mubr.msk.f32.vlgmr.msra.gmra.mxu0 %vm32_vm1, %v22_v3  ;;  %694 = vmatprep.subr.mxu0 %v761_v0  ;;  %vm20_vm7 = vmand %vm18_vm4, %vm19_vm5  ;;  %v150_v29 = vld [vmem:[%s1033_s1 + $0x20] sm:$0xff]  ;;  %v279_v62 = vld [vmem:[%s1033_s1 + $0x88] sm:$0xff] }
   0x6   :  { %710 = vmatprep.mubr.msk.f32.mxu0 %vm762_vm0, %v761_v0  ;;  %vm21_vm8 = vmor %vm17_vm6, %vm20_vm7  ;;  %677 = vmatprep.subr.mxu1 %v761_v0  ;;  %v613_v39 = vld [vmem:[%s1035_s2 + $0x1] ss:$0 sm:$0xff]  ;;  %v614_v41 = vld [vmem:[%s1035_s2 + $0x2] ss:$0 sm:$0xff] }
   0x7   :  { %678 = vmatpush3.msra.mxu1 %v154_v25  ;;  %v615_v45 = vld [vmem:[%s1035_s2 + $0x3] ss:$0 sm:$0xff]  ;;  %695 = vmatpush3.msra.mxu0 %v279_v62  ;;  %v277_v1 = vld [vmem:[%s1033_s1 + $0x78] sm:$0xff]  ;;  %v276_v2 = vld [vmem:[%s1033_s1 + $0x70] sm:$0xff] }
   0x8   :  { %679 = vmatprep.subr.mxu1 %v761_v0  ;;  %v278_v63 = vld [vmem:[%s1033_s1 + $0x80] sm:$0xff]  ;;  %696 = vmatprep.subr.mxu0 %v761_v0  ;;  %v275_v3 = vld [vmem:[%s1033_s1 + $0x68] sm:$0xff] }
   0x9   :  { %680 = vmatpush3.msra.mxu1 %v153_v26  ;;  %697 = vmatpush3.msra.mxu0 %v278_v63  ;;  %v274_v4 = vld [vmem:[%s1033_s1 + $0x60] sm:$0xff]  ;;  %v627_v5 = vld [vmem:[%s1035_s2 + $0xc] ss:$0 sm:$0xff] }
   0xa   :  { %681 = vmatprep.subr.mxu1 %v761_v0  ;;  %698 = vmatprep.subr.mxu0 %v761_v0 }
   0xb   :  { %682 = vmatpush3.msra.mxu1 %v152_v27  ;;  %699 = vmatpush3.msra.mxu0 %v277_v1 }
   0xc   :  { %683 = vmatprep.subr.mxu1 %v761_v0  ;;  %700 = vmatprep.subr.mxu0 %v761_v0 }
   0xd   :  { %684 = vmatpush3.msra.mxu1 %v151_v28  ;;  %701 = vmatpush3.msra.mxu0 %v276_v2 }
   0xe   :  { %685 = vmatprep.subr.mxu1 %v761_v0  ;;  %702 = vmatprep.subr.mxu0 %v761_v0 }
   0xf   :  { %686 = vmatpush3.msra.mxu1 %v150_v29  ;;  %703 = vmatpush3.msra.mxu0 %v275_v3 }
  0x10   :  { %687 = vmatprep.subr.mxu1 %v761_v0  ;;  %704 = vmatprep.subr.mxu0 %v761_v0 }
  0x11   :  { %688 = vmatpush3.msra.mxu1 %v149_v30  ;;  %705 = vmatpush3.msra.mxu0 %v274_v4 }
  0x12   :  { %689 = vmatprep.subr.mxu1 %v761_v0  ;;  %706 = vmatprep.subr.mxu0 %v761_v0 }
  0x13   :  { %690 = vmatpush3.msra.mxu1 %v148_v31 }
  0x14   :  { %713 = vmatprep.subr.mxu1 %v761_v0 }
  0xc5   :  { %v102_v7 = vpop.f32.mrf.mxu0 }
  0xc6   :  { %v103_v8 = vadd.f32 %v611_v6, %v102_v7  ;;  %v273_v6 = vld [vmem:[%s1033_s1 + $0x58] sm:$0xff]  ;;  %v272_v7 = vld [vmem:[%s1033_s1 + $0x50] sm:$0xff] }
  0xc7   :  { %v674_v9 = vpop.f32.mrf.mxu0  ;;  %707 = vmatpush3.msra.mxu0 %v273_v6 }
  0xc8   :  { %v107_v10 = vsel %vm106_vm2, %v103_v8, 0.0  ;;  %v112_v11 = vsel %vm16_vm3, %v103_v8, 0.0  ;;  %708 = vmatprep.subr.mxu0 %v761_v0 }
  0xc9   :  { %108 = vadd.xlane.f32.xlu0 %v107_v10  ;;  %v113_v12 = vsel %vm106_vm2, %v112_v11, 0.0  ;;  %709 = vmatpush3.msra.mxu0 %v272_v7 }
  0xca   :  { %732 = vmatprep.subr.mxu0 %v761_v0 }
  0xcd   :  { %114 = vadd.xlane.f32.xlu0 %v113_v12 }
 0x152   :  { %v109_v13 = vpop.xlane.xlu0 %108 }
 0x156   :  { %v115_v14 = vpop.xlane.xlu0 %114 }
 0x157   :  { %v116_v15 = vsub.f32 %v109_v13, %v115_v14 }
 0x159   :  { %v117_v16 = vsel %vm16_vm3, %v115_v14, %v116_v15  ;;  %v617_v15 = vld [vmem:[%s1035_s2 + $0x4] ss:$0 sm:$0xff] }
 0x15a   :  { %v118_v17 = vmul.f32 0.0625, %v117_v16 }
 0x15c   :  { %v119_v18 = vsub.f32 %v103_v8, %v118_v17  ;;  %v618_v17 = vld [vmem:[%s1035_s2 + $0x5] ss:$0 sm:$0xff] }
 0x15e   :  { %v120_v19 = vmul.f32 %v119_v18, %v119_v18 }
 0x160   :  { %v123_v20 = vsel %vm21_vm8, %v120_v19, 0.0 }
 0x161   :  { %v124_v21 = vsel %vm106_vm2, %v123_v20, 0.0  ;;  %v127_v22 = vsel %vm16_vm3, %v123_v20, 0.0 }
 0x162   :  { %125 = vadd.xlane.f32.xlu1 %v124_v21  ;;  %v128_v23 = vsel %vm106_vm2, %v127_v22, 0.0  ;;  %v619_v21 = vld [vmem:[%s1035_s2 + $0x6] ss:$0 sm:$0xff] }
 0x166   :  { %129 = vadd.xlane.f32.xlu1 %v128_v23 }
 0x1eb   :  { %v126_v32 = vpop.xlane.xlu1 %125 }
 0x1ef   :  { %v130_v33 = vpop.xlane.xlu1 %129 }
 0x1f0   :  { %v131_v34 = vsub.f32 %v126_v32, %v130_v33 }
 0x1f2   :  { %v132_v35 = vsel %vm16_vm3, %v130_v33, %v131_v34 }
 0x1f3   :  { %v133_v36 = vmul.f32 0.0625, %v132_v35 }
 0x1f5   :  { %v134_v37 = vadd.f32 1e-05, %v133_v36 }
 0x1f7   :  { %753 = vrsqrt.f32 %v134_v37 }
 0x204   :  { %v754_v38 = vpop.eup %753 }
 0x205   :  { %v136_v40 = vmul.f32 %v754_v38, %v119_v18  ;;  %v403_v38 = vld [vmem:[%s1033_s1 + $0xc8] sm:$0xff] }
 0x207   :  { %v141_v42 = vmul.f32 %v613_v39, %v136_v40  ;;  %v402_v39 = vld [vmem:[%s1033_s1 + $0xc0] sm:$0xff]  ;;  %v401_v40 = vld [vmem:[%s1033_s1 + $0xb8] sm:$0xff] }
 0x209   :  { %v146_v43 = vadd.f32 %v614_v41, %v141_v42  ;;  %v400_v41 = vld [vmem:[%s1033_s1 + $0xb0] sm:$0xff]  ;;  %v399_v42 = vld [vmem:[%s1033_s1 + $0xa8] sm:$0xff] }
 0x20b   :  { %v147_v44 = vmax.f32 %v146_v43, 0.0  ;;  %v398_v43 = vld [vmem:[%s1033_s1 + $0xa0] sm:$0xff] }
 0x20d   :  { %692 = vmatmul.mubr.msk.f32.vlgmr.msra.gmra.mxu1 %vm106_vm2, %v147_v44  ;;  %v397_v44 = vld [vmem:[%s1033_s1 + $0x98] sm:$0xff] }
 0x20e   :  { %729 = vmatprep.mubr.msk.f32.mxu1 %vm762_vm0, %v761_v0  ;;  %714 = vmatpush3.msra.mxu1 %v403_v38 }
 0x20f   :  { %715 = vmatprep.subr.mxu1 %v761_v0 }
 0x210   :  { %716 = vmatpush3.msra.mxu1 %v402_v39 }
 0x211   :  { %717 = vmatprep.subr.mxu1 %v761_v0 }
 0x212   :  { %718 = vmatpush3.msra.mxu1 %v401_v40 }
 0x213   :  { %719 = vmatprep.subr.mxu1 %v761_v0 }
 0x214   :  { %720 = vmatpush3.msra.mxu1 %v400_v41 }
 0x215   :  { %721 = vmatprep.subr.mxu1 %v761_v0 }
 0x216   :  { %722 = vmatpush3.msra.mxu1 %v399_v42 }
 0x217   :  { %723 = vmatprep.subr.mxu1 %v761_v0 }
 0x218   :  { %724 = vmatpush3.msra.mxu1 %v398_v43 }
 0x219   :  { %725 = vmatprep.subr.mxu1 %v761_v0 }
 0x21a   :  { %726 = vmatpush3.msra.mxu1 %v397_v44 }
 0x21b   :  { %727 = vmatprep.subr.mxu1 %v761_v0 }
 0x2cd   :  { %v232_v46 = vpop.f32.mrf.mxu1 }
 0x2ce   :  { %v233_v47 = vadd.f32 %v615_v45, %v232_v46  ;;  %v396_v45 = vld [vmem:[%s1033_s1 + $0x90] sm:$0xff] }
 0x2cf   :  { %v693_v48 = vpop.f32.mrf.mxu1  ;;  %728 = vmatpush3.msra.mxu1 %v396_v45 }
 0x2d0   :  { %v236_v49 = vsel %vm106_vm2, %v233_v47, 0.0  ;;  %v239_v50 = vsel %vm16_vm3, %v233_v47, 0.0 }
 0x2d1   :  { %237 = vadd.xlane.f32.xlu0 %v236_v49  ;;  %v240_v51 = vsel %vm106_vm2, %v239_v50, 0.0 }
 0x2d2   :  { %241 = vadd.xlane.f32.xlu1 %v240_v51 }
 0x35a   :  { %v238_v52 = vpop.xlane.xlu0 %237 }
 0x35b   :  { %v242_v53 = vpop.xlane.xlu1 %241 }
 0x35c   :  { %v243_v54 = vsub.f32 %v238_v52, %v242_v53 }
 0x35e   :  { %v244_v55 = vsel %vm16_vm3, %v242_v53, %v243_v54  ;;  %v621_v53 = vld [vmem:[%s1035_s2 + $0x7] ss:$0 sm:$0xff] }
 0x35f   :  { %v245_v56 = vmul.f32 0.03125, %v244_v55  ;;  %v622_v55 = vld [vmem:[%s1035_s2 + $0x8] ss:$0 sm:$0xff] }
 0x361   :  { %v246_v57 = vsub.f32 %v233_v47, %v245_v56 }
 0x363   :  { %v247_v58 = vmul.f32 %v246_v57, %v246_v57 }
 0x365   :  { %v248_v59 = vsel %vm106_vm2, %v247_v58, 0.0  ;;  %v251_v60 = vsel %vm16_vm3, %v247_v58, 0.0 }
 0x366   :  { %249 = vadd.xlane.f32.xlu0 %v248_v59  ;;  %v252_v61 = vsel %vm106_vm2, %v251_v60, 0.0  ;;  %v623_v59 = vld [vmem:[%s1035_s2 + $0x9] ss:$0 sm:$0xff] }
 0x367   :  { %253 = vadd.xlane.f32.xlu1 %v252_v61 }
 0x3ef   :  { %v250_v8 = vpop.xlane.xlu0 %249 }
 0x3f0   :  { %v254_v9 = vpop.xlane.xlu1 %253 }
 0x3f1   :  { %v255_v10 = vsub.f32 %v250_v8, %v254_v9 }
 0x3f3   :  { %v256_v11 = vsel %vm16_vm3, %v254_v9, %v255_v10 }
 0x3f4   :  { %v257_v12 = vmul.f32 0.03125, %v256_v11 }
 0x3f6   :  { %v258_v13 = vadd.f32 1e-05, %v257_v12 }
 0x3f8   :  { %755 = vrsqrt.f32 %v258_v13 }
 0x405   :  { %v756_v14 = vpop.eup %755 }
 0x406   :  { %v260_v16 = vmul.f32 %v756_v14, %v246_v57  ;;  %v527_v14 = vld [vmem:[%s1033_s1 + $0x108] sm:$0xff] }
 0x408   :  { %v265_v18 = vmul.f32 %v617_v15, %v260_v16  ;;  %v526_v15 = vld [vmem:[%s1033_s1 + $0x100] sm:$0xff]  ;;  %v525_v16 = vld [vmem:[%s1033_s1 + $0xf8] sm:$0xff] }
 0x40a   :  { %v270_v19 = vadd.f32 %v618_v17, %v265_v18  ;;  %v524_v17 = vld [vmem:[%s1033_s1 + $0xf0] sm:$0xff]  ;;  %v523_v18 = vld [vmem:[%s1033_s1 + $0xe8] sm:$0xff] }
 0x40c   :  { %v271_v20 = vmax.f32 %v270_v19, 0.0  ;;  %v522_v19 = vld [vmem:[%s1033_s1 + $0xe0] sm:$0xff] }
 0x40e   :  { %711 = vmatmul.mubr.msk.f32.vlgmr.msra.gmra.mxu0 %vm106_vm2, %v271_v20  ;;  %v521_v20 = vld [vmem:[%s1033_s1 + $0xd8] sm:$0xff] }
 0x40f   :  { %748 = vmatprep.mubr.msk.f32.mxu0 %vm762_vm0, %v761_v0  ;;  %733 = vmatpush3.msra.mxu0 %v527_v14 }
 0x410   :  { %734 = vmatprep.subr.mxu0 %v761_v0 }
 0x411   :  { %735 = vmatpush3.msra.mxu0 %v526_v15 }
 0x412   :  { %736 = vmatprep.subr.mxu0 %v761_v0 }
 0x413   :  { %737 = vmatpush3.msra.mxu0 %v525_v16 }
 0x414   :  { %738 = vmatprep.subr.mxu0 %v761_v0 }
 0x415   :  { %739 = vmatpush3.msra.mxu0 %v524_v17 }
 0x416   :  { %740 = vmatprep.subr.mxu0 %v761_v0 }
 0x417   :  { %741 = vmatpush3.msra.mxu0 %v523_v18 }
 0x418   :  { %742 = vmatprep.subr.mxu0 %v761_v0 }
 0x419   :  { %743 = vmatpush3.msra.mxu0 %v522_v19 }
 0x41a   :  { %744 = vmatprep.subr.mxu0 %v761_v0 }
 0x41b   :  { %745 = vmatpush3.msra.mxu0 %v521_v20 }
 0x41c   :  { %746 = vmatprep.subr.mxu0 %v761_v0  ;;  %v626_v0 = vld [vmem:[%s1035_s2 + $0xb] ss:$0 sm:$0xff] }
 0x4ce   :  { %v356_v22 = vpop.f32.mrf.mxu0 }
 0x4cf   :  { %v357_v23 = vadd.f32 %v619_v21, %v356_v22  ;;  %v520_v21 = vld [vmem:[%s1033_s1 + $0xd0] sm:$0xff] }
 0x4d0   :  { %v712_v24 = vpop.f32.mrf.mxu0  ;;  %747 = vmatpush3.msra.mxu0 %v520_v21 }
 0x4d1   :  { %v360_v25 = vsel %vm106_vm2, %v357_v23, 0.0  ;;  %v363_v26 = vsel %vm16_vm3, %v357_v23, 0.0 }
 0x4d2   :  { %361 = vadd.xlane.f32.xlu0 %v360_v25  ;;  %v364_v27 = vsel %vm106_vm2, %v363_v26, 0.0 }
 0x4d3   :  { %365 = vadd.xlane.f32.xlu1 %v364_v27 }
 0x55b   :  { %v362_v28 = vpop.xlane.xlu0 %361 }
 0x55c   :  { %v366_v29 = vpop.xlane.xlu1 %365 }
 0x55d   :  { %v367_v30 = vsub.f32 %v362_v28, %v366_v29 }
 0x55f   :  { %v368_v31 = vsel %vm16_vm3, %v366_v29, %v367_v30  ;;  %v625_v29 = vld [vmem:[%s1035_s2 + $0xa] ss:$0 sm:$0xff] }
 0x560   :  { %v369_v32 = vmul.f32 0.03125, %v368_v31 }
 0x562   :  { %v370_v33 = vsub.f32 %v357_v23, %v369_v32 }
 0x564   :  { %v371_v34 = vmul.f32 %v370_v33, %v370_v33 }
 0x566   :  { %v372_v35 = vsel %vm106_vm2, %v371_v34, 0.0  ;;  %v375_v36 = vsel %vm16_vm3, %v371_v34, 0.0 }
 0x567   :  { %373 = vadd.xlane.f32.xlu0 %v372_v35  ;;  %v376_v37 = vsel %vm106_vm2, %v375_v36, 0.0 }
 0x568   :  { %377 = vadd.xlane.f32.xlu1 %v376_v37 }
 0x5f0   :  { %v374_v46 = vpop.xlane.xlu0 %373 }
 0x5f1   :  { %v378_v47 = vpop.xlane.xlu1 %377 }
 0x5f2   :  { %v379_v48 = vsub.f32 %v374_v46, %v378_v47 }
 0x5f4   :  { %v380_v49 = vsel %vm16_vm3, %v378_v47, %v379_v48 }
 0x5f5   :  { %v381_v50 = vmul.f32 0.03125, %v380_v49 }
 0x5f7   :  { %v382_v51 = vadd.f32 1e-05, %v381_v50 }
 0x5f9   :  { %757 = vrsqrt.f32 %v382_v51 }
 0x606   :  { %v758_v52 = vpop.eup %757 }
 0x607   :  { %v384_v54 = vmul.f32 %v758_v52, %v370_v33 }
 0x609   :  { %v389_v56 = vmul.f32 %v621_v53, %v384_v54 }
 0x60b   :  { %v394_v57 = vadd.f32 %v622_v55, %v389_v56 }
 0x60d   :  { %v395_v58 = vmax.f32 %v394_v57, 0.0 }
 0x60f   :  { %730 = vmatmul.mubr.msk.f32.vlgmr.msra.gmra.mxu1 %vm106_vm2, %v395_v58 }
 0x6cf   :  { %v480_v60 = vpop.f32.mrf.mxu1 }
 0x6d0   :  { %v481_v61 = vadd.f32 %v623_v59, %v480_v60 }
 0x6d1   :  { %v731_v62 = vpop.f32.mrf.mxu1 }
 0x6d2   :  { %v484_v63 = vsel %vm106_vm2, %v481_v61, 0.0  ;;  %v487_v1 = vsel %vm16_vm3, %v481_v61, 0.0 }
 0x6d3   :  { %485 = vadd.xlane.f32.xlu0 %v484_v63  ;;  %v488_v2 = vsel %vm106_vm2, %v487_v1, 0.0 }
 0x6d4   :  { %489 = vadd.xlane.f32.xlu1 %v488_v2 }
 0x75c   :  { %v486_v3 = vpop.xlane.xlu0 %485 }
 0x75d   :  { %v490_v4 = vpop.xlane.xlu1 %489 }
 0x75e   :  { %v491_v6 = vsub.f32 %v486_v3, %v490_v4 }
 0x760   :  { %v492_v7 = vsel %vm16_vm3, %v490_v4, %v491_v6 }
 0x761   :  { %v493_v8 = vmul.f32 0.03125, %v492_v7 }
 0x763   :  { %v494_v9 = vsub.f32 %v481_v61, %v493_v8 }
 0x765   :  { %v495_v10 = vmul.f32 %v494_v9, %v494_v9 }
 0x767   :  { %v496_v11 = vsel %vm106_vm2, %v495_v10, 0.0  ;;  %v499_v12 = vsel %vm16_vm3, %v495_v10, 0.0 }
 0x768   :  { %497 = vadd.xlane.f32.xlu0 %v496_v11  ;;  %v500_v13 = vsel %vm106_vm2, %v499_v12, 0.0 }
 0x769   :  { %501 = vadd.xlane.f32.xlu1 %v500_v13 }
 0x7f1   :  { %v498_v22 = vpop.xlane.xlu0 %497 }
 0x7f2   :  { %v502_v23 = vpop.xlane.xlu1 %501 }
 0x7f3   :  { %v503_v24 = vsub.f32 %v498_v22, %v502_v23 }
 0x7f5   :  { %v504_v25 = vsel %vm16_vm3, %v502_v23, %v503_v24 }
 0x7f6   :  { %v505_v26 = vmul.f32 0.03125, %v504_v25 }
 0x7f8   :  { %v506_v27 = vadd.f32 1e-05, %v505_v26 }
 0x7fa   :  { %759 = vrsqrt.f32 %v506_v27 }
 0x807   :  { %v760_v28 = vpop.eup %759 }
 0x808   :  { %v508_v30 = vmul.f32 %v760_v28, %v494_v9 }
 0x80a   :  { %v513_v31 = vmul.f32 %v625_v29, %v508_v30 }
 0x80c   :  { %v518_v32 = vadd.f32 %v626_v0, %v513_v31 }
 0x80e   :  { %v519_v33 = vmax.f32 %v518_v32, 0.0 }
 0x810   :  { %749 = vmatmul.mubr.msk.f32.vlgmr.msra.gmra.mxu0 %vm106_vm2, %v519_v33 }
 0x8d0   :  { %v602_v34 = vpop.f32.mrf.mxu0 }
 0x8d1   :  { %v603_v35 = vadd.f32 %v627_v5, %v602_v34 }
 0x8d2   :  { %v750_v36 = vpop.f32.mrf.mxu0 }
 0x8d3   :  { %606 = vst.msk [vmem:[%s1036_s3] sm:$0xff] %vm106_vm2, %v603_v35 }

</bundles_post_ra>
